<compile_context>
chip_gen: v5e
topology: v5e:2x2
jax: 0.10.0
libtpu: 0.0.40
codegen_flags: <defaults>
</compile_context>

<pallas_src>
import functools

import jax
import jax.numpy as jnp
from jax.experimental import pallas as pl
from jax.experimental.pallas import tpu as pltpu

_LN_EPS = 1e-5
_MASK_BIAS = -1e30  # finite "minus infinity"; the latent token is never masked, so every
                    # query row has at least one unmasked key (no all-masked NaN case).


def _layernorm(h, g, b, eps):
    mu = jnp.mean(h, axis=-1, keepdims=True)
    var = jnp.mean((h - mu) * (h - mu), axis=-1, keepdims=True)
    return (h - mu) * jax.lax.rsqrt(var + eps) * g + b


def _bf16_matmul(x_f32, w_bf16_ref):
    return jnp.dot(x_f32.astype(jnp.bfloat16), w_bf16_ref[...],
                   preferred_element_type=jnp.float32)


# ----------------------------------------------------------------------------
# Fused kernel: MultiScalePeakEmbedding + latent prepend + MHA block + FFN block
# (one batch element per grid step; grid axis marked "parallel" -> megacore shard)
# ----------------------------------------------------------------------------
def _encoder_kernel(
        # per-batch inputs
        x_ref, bias_ref,
        # peak-embedding params
        freqs_ref, w1_ref, b1_ref, w2_ref, b2_ref,
        hw_mz_ref, hw_int_ref, hb1_ref, hw2_ref, hb2_ref, lat_ref,
        # attention block params
        wqkv_ref, bqkv_ref, wo_ref, bo_ref, g1_ref, be1_ref,
        # FFN block params
        fw1_ref, fb1_ref, fw2_ref, fb2_ref, g2_ref, be2_ref,
        # output
        o_ref, *, n_head, eps):
    # ---------------- MultiScalePeakEmbedding ----------------
    xs = x_ref[...]                                   # (S, 2) f32
    mz = xs[:, 0:1]                                   # (S, 1)
    inten = xs[:, 1:2]                                # (S, 1)

    # multi-scale sinusoidal m/z encoding (EUP)
    enc = mz * freqs_ref[...]                         # (S, D/2)
    enc = jnp.concatenate([jnp.sin(enc), jnp.cos(enc)], axis=-1)   # (S, D)

    # mlp: Linear(D,D) -> ReLU -> Linear(D,D)
    h = _bf16_matmul(enc, w1_ref) + b1_ref[...]
    h = jnp.maximum(h, 0.0)
    h = _bf16_matmul(h, w2_ref) + b2_ref[...]

    # head: Linear(D+1,D) -> ReLU -> Linear(D,D); the (D+1)-wide matmul is split
    # into an aligned D-wide matmul + rank-1 intensity update.
    h = _bf16_matmul(h, hw_mz_ref) + inten * hw_int_ref[...] + hb1_ref[...]
    h = jnp.maximum(h, 0.0)
    h = _bf16_matmul(h, hw2_ref) + hb2_ref[...]

    # prepend the learned latent-spectrum token -> lane-dense (S1, D) slab
    x0 = jnp.concatenate([lat_ref[...], h], axis=0)   # (S1, D) f32

    # ---------------- Multi-head self-attention + residual + LN1 ----------------
    D = x0.shape[-1]
    hd = D // n_head
    scale = float(hd) ** -0.5

    qkv = _bf16_matmul(x0, wqkv_ref) + bqkv_ref[...]  # (S1, 3D) f32
    q = qkv[:, :D] * scale                            # fold 1/sqrt(hd) into q
    k = qkv[:, D:2 * D]
    v = qkv[:, 2 * D:]
    bias = bias_ref[...]                              # (1, S1) additive key-padding bias

    # TODO(synk): for long sequences, tile over KV blocks with online softmax
    # (flash-style) instead of materializing the full (S1, S1) scores per head.
    outs = []
    for hI in range(n_head):
        sl = slice(hI * hd, (hI + 1) * hd)
        qh, kh, vh = q[:, sl], k[:, sl], v[:, sl]     # (S1, hd)
        s = jax.lax.dot_general(qh, kh, (((1,), (1,)), ((), ())),
                                preferred_element_type=jnp.float32) + bias   # (S1,S1)
        m = jnp.max(s, axis=-1, keepdims=True)
        pexp = jnp.exp(s - m)
        denom = jnp.sum(pexp, axis=-1, keepdims=True)
        pnorm = pexp * pl.reciprocal(denom, approx=True)
        outs.append(jnp.dot(pnorm, vh, preferred_element_type=jnp.float32))  # (S1,hd)
    attn = jnp.concatenate(outs, axis=-1)             # (S1, D)

    attn = _bf16_matmul(attn, wo_ref) + bo_ref[...]
    h1 = _layernorm(x0 + attn, g1_ref[...], be1_ref[...], eps)

    # ---------------- FFN + residual + LN2 ----------------
    f = _bf16_matmul(h1, fw1_ref) + fb1_ref[...]
    f = jnp.maximum(f, 0.0)
    y = _bf16_matmul(f, fw2_ref) + fb2_ref[...]
    o_ref[...] = _layernorm(h1 + y, g2_ref[...], be2_ref[...], eps).astype(o_ref.dtype)


def _encoder_pallas(x, bias, p, n_head):
    B, S, _ = x.shape
    D = p["mlp_w1"].shape[0]
    S1 = S + 1

    full = lambda arr: pl.BlockSpec(arr.shape, lambda b: (0,) * arr.ndim)
    weights = (
        p["freqs"], p["mlp_w1"], p["mlp_b1"], p["mlp_w2"], p["mlp_b2"],
        p["head_w1_mz"], p["head_w1_int"], p["head_b1"], p["head_w2"], p["head_b2"],
        p["latent_spectrum"],
        p["in_proj_w"], p["in_proj_b"], p["out_proj_w"], p["out_proj_b"],
        p["ln1_g"], p["ln1_b"],
        p["ff_w1"], p["ff_b1"], p["ff_w2"], p["ff_b2"], p["ln2_g"], p["ln2_b"],
    )
    return pl.pallas_call(
        functools.partial(_encoder_kernel, n_head=n_head, eps=_LN_EPS),
        out_shape=jax.ShapeDtypeStruct((B, S1, D), jnp.float32),
        grid=(B,),
        in_specs=[
            pl.BlockSpec((None, S, 2), lambda b: (b, 0, 0)),      # spectrum (per batch)
            pl.BlockSpec((None, 1, S1), lambda b: (b, 0, 0)),     # key-padding bias
        ] + [full(w) for w in weights],
        out_specs=pl.BlockSpec((None, S1, D), lambda b: (b, 0, 0)),
        compiler_params=pltpu.CompilerParams(dimension_semantics=("parallel",)),
    )(x, bias, *weights)


# ----------------------------------------------------------------------------
# Parameter construction (deterministic, synthetic).  Arrays only -- no python
# scalars that would become tracers under jit.
# ----------------------------------------------------------------------------
def init_params(key, dim_model=128, dim_feedforward=256):
    D, F = dim_model, dim_feedforward
    ks = jax.random.split(key, 12)

    def w(k, shape, scale=0.02):
        # bf16 storage for MXU operands; f32 accumulation inside the kernel.
        return (scale * jax.random.normal(k, shape, dtype=jnp.float32)).astype(jnp.bfloat16)

    def zeros(n):
        return jnp.zeros((1, n), jnp.float32)

    # multi-scale sinusoidal frequencies: 2*pi / logspace(-2, -7, D/2)
    freqs = (2.0 * jnp.pi / jnp.logspace(-2.0, -7.0, D // 2, dtype=jnp.float32)
             ).reshape(1, D // 2)

    return dict(
        freqs=freqs,
        latent_spectrum=jax.random.normal(ks[0], (1, D), dtype=jnp.float32),
        # MultiScalePeakEmbedding.mlp : Linear(D,D) -> ReLU -> Linear(D,D)
        mlp_w1=w(ks[1], (D, D)), mlp_b1=zeros(D),
        mlp_w2=w(ks[2], (D, D)), mlp_b2=zeros(D),
        # MultiScalePeakEmbedding.head : Linear(D+1,D) -> ReLU -> Linear(D,D)
        # (weight split: first D rows act on the encoding, last row on intensity)
        head_w1_mz=w(ks[3], (D, D)),
        head_w1_int=0.02 * jax.random.normal(ks[4], (1, D), dtype=jnp.float32),
        head_b1=zeros(D),
        head_w2=w(ks[5], (D, D)), head_b2=zeros(D),
        # nn.TransformerEncoderLayer (post-norm, ReLU activation)
        in_proj_w=w(ks[6], (D, 3 * D)), in_proj_b=zeros(3 * D),
        out_proj_w=w(ks[7], (D, D)), out_proj_b=zeros(D),
        ln1_g=jnp.ones((1, D), jnp.float32), ln1_b=zeros(D),
        ff_w1=w(ks[8], (D, F)), ff_b1=zeros(F),
        ff_w2=w(ks[9], (F, D)), ff_b2=zeros(D),
        ln2_g=jnp.ones((1, D), jnp.float32), ln2_b=zeros(D),
    )


# ----------------------------------------------------------------------------
# Forward pass (mask glue in XLA, everything else inside one fused Pallas kernel)
# ----------------------------------------------------------------------------
def transformer_encoder_forward(params, x, x_mask=None, n_head=8):
    """x: (B, n_peaks, 2) float32 [m/z, intensity] -> (latent (B,n_peaks+1,D), mem_mask)."""
    B, S, _ = x.shape

    # mask: True for zero-padded peaks (matches ~x.sum(-1).bool())
    if x_mask is None:
        x_mask = jnp.sum(x, axis=2) == 0.0                                       # (B, S)
    mem_mask = jnp.concatenate([jnp.zeros((B, 1), dtype=bool), x_mask], axis=1)  # (B, S+1)
    bias = jnp.where(mem_mask, _MASK_BIAS, 0.0).astype(jnp.float32)[:, None, :]  # (B,1,S+1)

    latent = _encoder_pallas(x, bias, params, n_head)  # (B, S+1, D)
    return latent, mem_mask


# ----------------------------------------------------------------------------
if __name__ == "__main__":
    key = jax.random.PRNGKey(0)
    k_param, k_mz, k_int = jax.random.split(key, 3)

    B, N_PEAKS, D, H, F = 2, 8, 128, 8, 256
    params = init_params(k_param, dim_model=D, dim_feedforward=F)

    mz = jax.random.uniform(k_mz, (B, N_PEAKS, 1), minval=50.0, maxval=500.0)
    inten = jax.random.uniform(k_int, (B, N_PEAKS, 1), minval=0.1, maxval=1.0)
    x = jnp.concatenate([mz, inten], axis=-1).astype(jnp.float32)   # (B, n_peaks, 2)
    # zero-pad the last two peaks of the second spectrum (exercises key_padding_mask)
    x = x.at[1, -2:, :].set(0.0)

    fwd = jax.jit(transformer_encoder_forward, static_argnames=("n_head",))
    latent, mem_mask = fwd(params, x, n_head=H)
    latent = jax.block_until_ready(latent)
    mem_mask = jax.block_until_ready(mem_mask)

    assert latent.shape == (B, N_PEAKS + 1, D)
    assert mem_mask.shape == (B, N_PEAKS + 1)
    assert bool(jnp.all(jnp.isfinite(latent)))
    assert not bool(mem_mask[1, 0]) and bool(mem_mask[1, -1])

    print("KERNEL_OK")
</pallas_src>

<mosaic_0001>
module attributes {stable_mosaic.version = 11 : i64} {
  func.func @_encoder_kernel(%arg0: i32, %arg1: memref<1x8x2xf32, #tpu.memory_space<vmem>>, %arg2: memref<1x1x9xf32, #tpu.memory_space<vmem>>, %arg3: memref<1x64xf32, #tpu.memory_space<vmem>>, %arg4: memref<128x128xbf16, #tpu.memory_space<vmem>>, %arg5: memref<1x128xf32, #tpu.memory_space<vmem>>, %arg6: memref<128x128xbf16, #tpu.memory_space<vmem>>, %arg7: memref<1x128xf32, #tpu.memory_space<vmem>>, %arg8: memref<128x128xbf16, #tpu.memory_space<vmem>>, %arg9: memref<1x128xf32, #tpu.memory_space<vmem>>, %arg10: memref<1x128xf32, #tpu.memory_space<vmem>>, %arg11: memref<128x128xbf16, #tpu.memory_space<vmem>>, %arg12: memref<1x128xf32, #tpu.memory_space<vmem>>, %arg13: memref<1x128xf32, #tpu.memory_space<vmem>>, %arg14: memref<128x384xbf16, #tpu.memory_space<vmem>>, %arg15: memref<1x384xf32, #tpu.memory_space<vmem>>, %arg16: memref<128x128xbf16, #tpu.memory_space<vmem>>, %arg17: memref<1x128xf32, #tpu.memory_space<vmem>>, %arg18: memref<1x128xf32, #tpu.memory_space<vmem>>, %arg19: memref<1x128xf32, #tpu.memory_space<vmem>>, %arg20: memref<128x256xbf16, #tpu.memory_space<vmem>>, %arg21: memref<1x256xf32, #tpu.memory_space<vmem>>, %arg22: memref<256x128xbf16, #tpu.memory_space<vmem>>, %arg23: memref<1x128xf32, #tpu.memory_space<vmem>>, %arg24: memref<1x128xf32, #tpu.memory_space<vmem>>, %arg25: memref<1x128xf32, #tpu.memory_space<vmem>>, %arg26: memref<1x9x128xf32, #tpu.memory_space<vmem>>) attributes {dimension_semantics = [#tpu.dimension_semantics<parallel>], iteration_bounds = array<i64: 2>, scalar_prefetch = 0 : i64, scratch_operands = 0 : i64, tpu.core_type = #tpu.core_type<tc>, window_params = [{transform_indices = @transform_0, window_bounds = array<i64: 1, 8, 2>}, {transform_indices = @transform_1, window_bounds = array<i64: 1, 1, 9>}, {pipeline_mode = #tpu.pipeline_mode<synchronous>, transform_indices = @transform_2, window_bounds = array<i64: 1, 64>}, {pipeline_mode = #tpu.pipeline_mode<synchronous>, transform_indices = @transform_3, window_bounds = array<i64: 128, 128>}, {pipeline_mode = #tpu.pipeline_mode<synchronous>, transform_indices = @transform_4, window_bounds = array<i64: 1, 128>}, {pipeline_mode = #tpu.pipeline_mode<synchronous>, transform_indices = @transform_5, window_bounds = array<i64: 128, 128>}, {pipeline_mode = #tpu.pipeline_mode<synchronous>, transform_indices = @transform_6, window_bounds = array<i64: 1, 128>}, {pipeline_mode = #tpu.pipeline_mode<synchronous>, transform_indices = @transform_7, window_bounds = array<i64: 128, 128>}, {pipeline_mode = #tpu.pipeline_mode<synchronous>, transform_indices = @transform_8, window_bounds = array<i64: 1, 128>}, {pipeline_mode = #tpu.pipeline_mode<synchronous>, transform_indices = @transform_9, window_bounds = array<i64: 1, 128>}, {pipeline_mode = #tpu.pipeline_mode<synchronous>, transform_indices = @transform_10, window_bounds = array<i64: 128, 128>}, {pipeline_mode = #tpu.pipeline_mode<synchronous>, transform_indices = @transform_11, window_bounds = array<i64: 1, 128>}, {pipeline_mode = #tpu.pipeline_mode<synchronous>, transform_indices = @transform_12, window_bounds = array<i64: 1, 128>}, {pipeline_mode = #tpu.pipeline_mode<synchronous>, transform_indices = @transform_13, window_bounds = array<i64: 128, 384>}, {pipeline_mode = #tpu.pipeline_mode<synchronous>, transform_indices = @transform_14, window_bounds = array<i64: 1, 384>}, {pipeline_mode = #tpu.pipeline_mode<synchronous>, transform_indices = @transform_15, window_bounds = array<i64: 128, 128>}, {pipeline_mode = #tpu.pipeline_mode<synchronous>, transform_indices = @transform_16, window_bounds = array<i64: 1, 128>}, {pipeline_mode = #tpu.pipeline_mode<synchronous>, transform_indices = @transform_17, window_bounds = array<i64: 1, 128>}, {pipeline_mode = #tpu.pipeline_mode<synchronous>, transform_indices = @transform_18, window_bounds = array<i64: 1, 128>}, {pipeline_mode = #tpu.pipeline_mode<synchronous>, transform_indices = @transform_19, window_bounds = array<i64: 128, 256>}, {pipeline_mode = #tpu.pipeline_mode<synchronous>, transform_indices = @transform_20, window_bounds = array<i64: 1, 256>}, {pipeline_mode = #tpu.pipeline_mode<synchronous>, transform_indices = @transform_21, window_bounds = array<i64: 256, 128>}, {pipeline_mode = #tpu.pipeline_mode<synchronous>, transform_indices = @transform_22, window_bounds = array<i64: 1, 128>}, {pipeline_mode = #tpu.pipeline_mode<synchronous>, transform_indices = @transform_23, window_bounds = array<i64: 1, 128>}, {pipeline_mode = #tpu.pipeline_mode<synchronous>, transform_indices = @transform_24, window_bounds = array<i64: 1, 128>}, {transform_indices = @transform_25, window_bounds = array<i64: 1, 9, 128>}]} {
    %c0 = arith.constant 0 : index
    %c0_0 = arith.constant 0 : index
    %c0_1 = arith.constant 0 : index
    %0 = vector.load %arg1[%c0, %c0_0, %c0_1] : memref<1x8x2xf32, #tpu.memory_space<vmem>>, vector<1x8x2xf32>
    %1 = vector.shape_cast %0 : vector<1x8x2xf32> to vector<8x2xf32>
    %2 = vector.extract_strided_slice %1 {offsets = [0, 0], sizes = [8, 1], strides = [1, 1]} : vector<8x2xf32> to vector<8x1xf32>
    %3 = vector.extract_strided_slice %1 {offsets = [0, 1], sizes = [8, 1], strides = [1, 1]} : vector<8x2xf32> to vector<8x1xf32>
    %c0_2 = arith.constant 0 : index
    %c0_3 = arith.constant 0 : index
    %4 = vector.load %arg3[%c0_2, %c0_3] : memref<1x64xf32, #tpu.memory_space<vmem>>, vector<1x64xf32>
    %5 = vector.broadcast %2 : vector<8x1xf32> to vector<8x64xf32>
    %6 = vector.broadcast %4 : vector<1x64xf32> to vector<8x64xf32>
    %7 = arith.mulf %5, %6 : vector<8x64xf32>
    %8 = math.sin %7 : vector<8x64xf32>
    %9 = math.cos %7 : vector<8x64xf32>
    %10 = tpu.concatenate %8, %9 in 1 : vector<8x64xf32>, vector<8x64xf32> -> vector<8x128xf32>
    %11 = arith.truncf %10 : vector<8x128xf32> to vector<8x128xbf16>
    %c0_4 = arith.constant 0 : index
    %c0_5 = arith.constant 0 : index
    %12 = vector.load %arg4[%c0_4, %c0_5] : memref<128x128xbf16, #tpu.memory_space<vmem>>, vector<128x128xbf16>
    %cst = arith.constant dense<0.000000e+00> : vector<8x128xf32>
    %13 = tpu.matmul %11, %12, %cst {dimension_numbers = #tpu.dot_dimension_numbers<[1], [0], [0], [1], [0, 0, 1, 1], [], []>} : vector<8x128xbf16>, vector<128x128xbf16>, vector<8x128xf32> -> vector<8x128xf32>
    %c0_6 = arith.constant 0 : index
    %c0_7 = arith.constant 0 : index
    %14 = vector.load %arg5[%c0_6, %c0_7] : memref<1x128xf32, #tpu.memory_space<vmem>>, vector<1x128xf32>
    %15 = vector.broadcast %14 : vector<1x128xf32> to vector<8x128xf32>
    %16 = arith.addf %13, %15 : vector<8x128xf32>
    %cst_8 = arith.constant 0.000000e+00 : f32
    %17 = vector.broadcast %cst_8 : f32 to vector<8x128xf32>
    %18 = arith.maximumf %16, %17 : vector<8x128xf32>
    %19 = arith.truncf %18 : vector<8x128xf32> to vector<8x128xbf16>
    %c0_9 = arith.constant 0 : index
    %c0_10 = arith.constant 0 : index
    %20 = vector.load %arg6[%c0_9, %c0_10] : memref<128x128xbf16, #tpu.memory_space<vmem>>, vector<128x128xbf16>
    %cst_11 = arith.constant dense<0.000000e+00> : vector<8x128xf32>
    %21 = tpu.matmul %19, %20, %cst_11 {dimension_numbers = #tpu.dot_dimension_numbers<[1], [0], [0], [1], [0, 0, 1, 1], [], []>} : vector<8x128xbf16>, vector<128x128xbf16>, vector<8x128xf32> -> vector<8x128xf32>
    %c0_12 = arith.constant 0 : index
    %c0_13 = arith.constant 0 : index
    %22 = vector.load %arg7[%c0_12, %c0_13] : memref<1x128xf32, #tpu.memory_space<vmem>>, vector<1x128xf32>
    %23 = vector.broadcast %22 : vector<1x128xf32> to vector<8x128xf32>
    %24 = arith.addf %21, %23 : vector<8x128xf32>
    %25 = arith.truncf %24 : vector<8x128xf32> to vector<8x128xbf16>
    %c0_14 = arith.constant 0 : index
    %c0_15 = arith.constant 0 : index
    %26 = vector.load %arg8[%c0_14, %c0_15] : memref<128x128xbf16, #tpu.memory_space<vmem>>, vector<128x128xbf16>
    %cst_16 = arith.constant dense<0.000000e+00> : vector<8x128xf32>
    %27 = tpu.matmul %25, %26, %cst_16 {dimension_numbers = #tpu.dot_dimension_numbers<[1], [0], [0], [1], [0, 0, 1, 1], [], []>} : vector<8x128xbf16>, vector<128x128xbf16>, vector<8x128xf32> -> vector<8x128xf32>
    %c0_17 = arith.constant 0 : index
    %c0_18 = arith.constant 0 : index
    %28 = vector.load %arg9[%c0_17, %c0_18] : memref<1x128xf32, #tpu.memory_space<vmem>>, vector<1x128xf32>
    %29 = vector.broadcast %3 : vector<8x1xf32> to vector<8x128xf32>
    %30 = vector.broadcast %28 : vector<1x128xf32> to vector<8x128xf32>
    %31 = arith.mulf %29, %30 : vector<8x128xf32>
    %32 = arith.addf %27, %31 : vector<8x128xf32>
    %c0_19 = arith.constant 0 : index
    %c0_20 = arith.constant 0 : index
    %33 = vector.load %arg10[%c0_19, %c0_20] : memref<1x128xf32, #tpu.memory_space<vmem>>, vector<1x128xf32>
    %34 = vector.broadcast %33 : vector<1x128xf32> to vector<8x128xf32>
    %35 = arith.addf %32, %34 : vector<8x128xf32>
    %cst_21 = arith.constant 0.000000e+00 : f32
    %36 = vector.broadcast %cst_21 : f32 to vector<8x128xf32>
    %37 = arith.maximumf %35, %36 : vector<8x128xf32>
    %38 = arith.truncf %37 : vector<8x128xf32> to vector<8x128xbf16>
    %c0_22 = arith.constant 0 : index
    %c0_23 = arith.constant 0 : index
    %39 = vector.load %arg11[%c0_22, %c0_23] : memref<128x128xbf16, #tpu.memory_space<vmem>>, vector<128x128xbf16>
    %cst_24 = arith.constant dense<0.000000e+00> : vector<8x128xf32>
    %40 = tpu.matmul %38, %39, %cst_24 {dimension_numbers = #tpu.dot_dimension_numbers<[1], [0], [0], [1], [0, 0, 1, 1], [], []>} : vector<8x128xbf16>, vector<128x128xbf16>, vector<8x128xf32> -> vector<8x128xf32>
    %c0_25 = arith.constant 0 : index
    %c0_26 = arith.constant 0 : index
    %41 = vector.load %arg12[%c0_25, %c0_26] : memref<1x128xf32, #tpu.memory_space<vmem>>, vector<1x128xf32>
    %42 = vector.broadcast %41 : vector<1x128xf32> to vector<8x128xf32>
    %43 = arith.addf %40, %42 : vector<8x128xf32>
    %c0_27 = arith.constant 0 : index
    %c0_28 = arith.constant 0 : index
    %44 = vector.load %arg13[%c0_27, %c0_28] : memref<1x128xf32, #tpu.memory_space<vmem>>, vector<1x128xf32>
    %45 = tpu.concatenate %44, %43 in 0 : vector<1x128xf32>, vector<8x128xf32> -> vector<9x128xf32>
    %46 = arith.truncf %45 : vector<9x128xf32> to vector<9x128xbf16>
    %c0_29 = arith.constant 0 : index
    %c0_30 = arith.constant 0 : index
    %47 = vector.load %arg14[%c0_29, %c0_30] : memref<128x384xbf16, #tpu.memory_space<vmem>>, vector<128x384xbf16>
    %cst_31 = arith.constant dense<0.000000e+00> : vector<9x384xf32>
    %48 = tpu.matmul %46, %47, %cst_31 {dimension_numbers = #tpu.dot_dimension_numbers<[1], [0], [0], [1], [0, 0, 1, 1], [], []>} : vector<9x128xbf16>, vector<128x384xbf16>, vector<9x384xf32> -> vector<9x384xf32>
    %c0_32 = arith.constant 0 : index
    %c0_33 = arith.constant 0 : index
    %49 = vector.load %arg15[%c0_32, %c0_33] : memref<1x384xf32, #tpu.memory_space<vmem>>, vector<1x384xf32>
    %50 = vector.broadcast %49 : vector<1x384xf32> to vector<9x384xf32>
    %51 = arith.addf %48, %50 : vector<9x384xf32>
    %52 = vector.extract_strided_slice %51 {offsets = [0, 0], sizes = [9, 128], strides = [1, 1]} : vector<9x384xf32> to vector<9x128xf32>
    %cst_34 = arith.constant 2.500000e-01 : f32
    %53 = vector.broadcast %cst_34 : f32 to vector<9x128xf32>
    %54 = arith.mulf %52, %53 : vector<9x128xf32>
    %55 = vector.extract_strided_slice %51 {offsets = [0, 128], sizes = [9, 128], strides = [1, 1]} : vector<9x384xf32> to vector<9x128xf32>
    %56 = vector.extract_strided_slice %51 {offsets = [0, 256], sizes = [9, 128], strides = [1, 1]} : vector<9x384xf32> to vector<9x128xf32>
    %c0_35 = arith.constant 0 : index
    %c0_36 = arith.constant 0 : index
    %c0_37 = arith.constant 0 : index
    %57 = vector.load %arg2[%c0_35, %c0_36, %c0_37] : memref<1x1x9xf32, #tpu.memory_space<vmem>>, vector<1x1x9xf32>
    %58 = vector.shape_cast %57 : vector<1x1x9xf32> to vector<1x9xf32>
    %59 = vector.extract_strided_slice %54 {offsets = [0, 0], sizes = [9, 16], strides = [1, 1]} : vector<9x128xf32> to vector<9x16xf32>
    %60 = vector.extract_strided_slice %55 {offsets = [0, 0], sizes = [9, 16], strides = [1, 1]} : vector<9x128xf32> to vector<9x16xf32>
    %61 = vector.extract_strided_slice %56 {offsets = [0, 0], sizes = [9, 16], strides = [1, 1]} : vector<9x128xf32> to vector<9x16xf32>
    %cst_38 = arith.constant dense<0.000000e+00> : vector<9x9xf32>
    %62 = tpu.matmul %59, %60, %cst_38 {dimension_numbers = #tpu.dot_dimension_numbers<[1], [1], [0], [0], [0, 0, 1, 0], [], []>} : vector<9x16xf32>, vector<9x16xf32>, vector<9x9xf32> -> vector<9x9xf32>
    %63 = vector.broadcast %58 : vector<1x9xf32> to vector<9x9xf32>
    %64 = arith.addf %62, %63 : vector<9x9xf32>
    %cst_39 = arith.constant dense<0xFF800000> : vector<9xf32>
    %65 = vector.multi_reduction <maximumf>, %64, %cst_39 [1] : vector<9x9xf32> to vector<9xf32>
    %66 = vector.shape_cast %65 : vector<9xf32> to vector<9x1xf32>
    %67 = vector.broadcast %66 : vector<9x1xf32> to vector<9x9xf32>
    %68 = arith.subf %64, %67 : vector<9x9xf32>
    %69 = math.exp %68 : vector<9x9xf32>
    %cst_40 = arith.constant dense<0.000000e+00> : vector<9xf32>
    %70 = vector.multi_reduction <add>, %69, %cst_40 [1] : vector<9x9xf32> to vector<9xf32>
    %71 = vector.shape_cast %70 : vector<9xf32> to vector<9x1xf32>
    %72 = tpu.reciprocal %71 {approx = true} : vector<9x1xf32> -> vector<9x1xf32>
    %73 = vector.broadcast %72 : vector<9x1xf32> to vector<9x9xf32>
    %74 = arith.mulf %69, %73 : vector<9x9xf32>
    %cst_41 = arith.constant dense<0.000000e+00> : vector<9x16xf32>
    %75 = tpu.matmul %74, %61, %cst_41 {dimension_numbers = #tpu.dot_dimension_numbers<[1], [0], [0], [1], [0, 0, 1, 1], [], []>} : vector<9x9xf32>, vector<9x16xf32>, vector<9x16xf32> -> vector<9x16xf32>
    %76 = vector.extract_strided_slice %54 {offsets = [0, 16], sizes = [9, 16], strides = [1, 1]} : vector<9x128xf32> to vector<9x16xf32>
    %77 = vector.extract_strided_slice %55 {offsets = [0, 16], sizes = [9, 16], strides = [1, 1]} : vector<9x128xf32> to vector<9x16xf32>
    %78 = vector.extract_strided_slice %56 {offsets = [0, 16], sizes = [9, 16], strides = [1, 1]} : vector<9x128xf32> to vector<9x16xf32>
    %cst_42 = arith.constant dense<0.000000e+00> : vector<9x9xf32>
    %79 = tpu.matmul %76, %77, %cst_42 {dimension_numbers = #tpu.dot_dimension_numbers<[1], [1], [0], [0], [0, 0, 1, 0], [], []>} : vector<9x16xf32>, vector<9x16xf32>, vector<9x9xf32> -> vector<9x9xf32>
    %80 = vector.broadcast %58 : vector<1x9xf32> to vector<9x9xf32>
    %81 = arith.addf %79, %80 : vector<9x9xf32>
    %cst_43 = arith.constant dense<0xFF800000> : vector<9xf32>
    %82 = vector.multi_reduction <maximumf>, %81, %cst_43 [1] : vector<9x9xf32> to vector<9xf32>
    %83 = vector.shape_cast %82 : vector<9xf32> to vector<9x1xf32>
    %84 = vector.broadcast %83 : vector<9x1xf32> to vector<9x9xf32>
    %85 = arith.subf %81, %84 : vector<9x9xf32>
    %86 = math.exp %85 : vector<9x9xf32>
    %cst_44 = arith.constant dense<0.000000e+00> : vector<9xf32>
    %87 = vector.multi_reduction <add>, %86, %cst_44 [1] : vector<9x9xf32> to vector<9xf32>
    %88 = vector.shape_cast %87 : vector<9xf32> to vector<9x1xf32>
    %89 = tpu.reciprocal %88 {approx = true} : vector<9x1xf32> -> vector<9x1xf32>
    %90 = vector.broadcast %89 : vector<9x1xf32> to vector<9x9xf32>
    %91 = arith.mulf %86, %90 : vector<9x9xf32>
    %cst_45 = arith.constant dense<0.000000e+00> : vector<9x16xf32>
    %92 = tpu.matmul %91, %78, %cst_45 {dimension_numbers = #tpu.dot_dimension_numbers<[1], [0], [0], [1], [0, 0, 1, 1], [], []>} : vector<9x9xf32>, vector<9x16xf32>, vector<9x16xf32> -> vector<9x16xf32>
    %93 = vector.extract_strided_slice %54 {offsets = [0, 32], sizes = [9, 16], strides = [1, 1]} : vector<9x128xf32> to vector<9x16xf32>
    %94 = vector.extract_strided_slice %55 {offsets = [0, 32], sizes = [9, 16], strides = [1, 1]} : vector<9x128xf32> to vector<9x16xf32>
    %95 = vector.extract_strided_slice %56 {offsets = [0, 32], sizes = [9, 16], strides = [1, 1]} : vector<9x128xf32> to vector<9x16xf32>
    %cst_46 = arith.constant dense<0.000000e+00> : vector<9x9xf32>
    %96 = tpu.matmul %93, %94, %cst_46 {dimension_numbers = #tpu.dot_dimension_numbers<[1], [1], [0], [0], [0, 0, 1, 0], [], []>} : vector<9x16xf32>, vector<9x16xf32>, vector<9x9xf32> -> vector<9x9xf32>
    %97 = vector.broadcast %58 : vector<1x9xf32> to vector<9x9xf32>
    %98 = arith.addf %96, %97 : vector<9x9xf32>
    %cst_47 = arith.constant dense<0xFF800000> : vector<9xf32>
    %99 = vector.multi_reduction <maximumf>, %98, %cst_47 [1] : vector<9x9xf32> to vector<9xf32>
    %100 = vector.shape_cast %99 : vector<9xf32> to vector<9x1xf32>
    %101 = vector.broadcast %100 : vector<9x1xf32> to vector<9x9xf32>
    %102 = arith.subf %98, %101 : vector<9x9xf32>
    %103 = math.exp %102 : vector<9x9xf32>
    %cst_48 = arith.constant dense<0.000000e+00> : vector<9xf32>
    %104 = vector.multi_reduction <add>, %103, %cst_48 [1] : vector<9x9xf32> to vector<9xf32>
    %105 = vector.shape_cast %104 : vector<9xf32> to vector<9x1xf32>
    %106 = tpu.reciprocal %105 {approx = true} : vector<9x1xf32> -> vector<9x1xf32>
    %107 = vector.broadcast %106 : vector<9x1xf32> to vector<9x9xf32>
    %108 = arith.mulf %103, %107 : vector<9x9xf32>
    %cst_49 = arith.constant dense<0.000000e+00> : vector<9x16xf32>
    %109 = tpu.matmul %108, %95, %cst_49 {dimension_numbers = #tpu.dot_dimension_numbers<[1], [0], [0], [1], [0, 0, 1, 1], [], []>} : vector<9x9xf32>, vector<9x16xf32>, vector<9x16xf32> -> vector<9x16xf32>
    %110 = vector.extract_strided_slice %54 {offsets = [0, 48], sizes = [9, 16], strides = [1, 1]} : vector<9x128xf32> to vector<9x16xf32>
    %111 = vector.extract_strided_slice %55 {offsets = [0, 48], sizes = [9, 16], strides = [1, 1]} : vector<9x128xf32> to vector<9x16xf32>
    %112 = vector.extract_strided_slice %56 {offsets = [0, 48], sizes = [9, 16], strides = [1, 1]} : vector<9x128xf32> to vector<9x16xf32>
    %cst_50 = arith.constant dense<0.000000e+00> : vector<9x9xf32>
    %113 = tpu.matmul %110, %111, %cst_50 {dimension_numbers = #tpu.dot_dimension_numbers<[1], [1], [0], [0], [0, 0, 1, 0], [], []>} : vector<9x16xf32>, vector<9x16xf32>, vector<9x9xf32> -> vector<9x9xf32>
    %114 = vector.broadcast %58 : vector<1x9xf32> to vector<9x9xf32>
    %115 = arith.addf %113, %114 : vector<9x9xf32>
    %cst_51 = arith.constant dense<0xFF800000> : vector<9xf32>
    %116 = vector.multi_reduction <maximumf>, %115, %cst_51 [1] : vector<9x9xf32> to vector<9xf32>
    %117 = vector.shape_cast %116 : vector<9xf32> to vector<9x1xf32>
    %118 = vector.broadcast %117 : vector<9x1xf32> to vector<9x9xf32>
    %119 = arith.subf %115, %118 : vector<9x9xf32>
    %120 = math.exp %119 : vector<9x9xf32>
    %cst_52 = arith.constant dense<0.000000e+00> : vector<9xf32>
    %121 = vector.multi_reduction <add>, %120, %cst_52 [1] : vector<9x9xf32> to vector<9xf32>
    %122 = vector.shape_cast %121 : vector<9xf32> to vector<9x1xf32>
    %123 = tpu.reciprocal %122 {approx = true} : vector<9x1xf32> -> vector<9x1xf32>
    %124 = vector.broadcast %123 : vector<9x1xf32> to vector<9x9xf32>
    %125 = arith.mulf %120, %124 : vector<9x9xf32>
    %cst_53 = arith.constant dense<0.000000e+00> : vector<9x16xf32>
    %126 = tpu.matmul %125, %112, %cst_53 {dimension_numbers = #tpu.dot_dimension_numbers<[1], [0], [0], [1], [0, 0, 1, 1], [], []>} : vector<9x9xf32>, vector<9x16xf32>, vector<9x16xf32> -> vector<9x16xf32>
    %127 = vector.extract_strided_slice %54 {offsets = [0, 64], sizes = [9, 16], strides = [1, 1]} : vector<9x128xf32> to vector<9x16xf32>
    %128 = vector.extract_strided_slice %55 {offsets = [0, 64], sizes = [9, 16], strides = [1, 1]} : vector<9x128xf32> to vector<9x16xf32>
    %129 = vector.extract_strided_slice %56 {offsets = [0, 64], sizes = [9, 16], strides = [1, 1]} : vector<9x128xf32> to vector<9x16xf32>
    %cst_54 = arith.constant dense<0.000000e+00> : vector<9x9xf32>
    %130 = tpu.matmul %127, %128, %cst_54 {dimension_numbers = #tpu.dot_dimension_numbers<[1], [1], [0], [0], [0, 0, 1, 0], [], []>} : vector<9x16xf32>, vector<9x16xf32>, vector<9x9xf32> -> vector<9x9xf32>
    %131 = vector.broadcast %58 : vector<1x9xf32> to vector<9x9xf32>
    %132 = arith.addf %130, %131 : vector<9x9xf32>
    %cst_55 = arith.constant dense<0xFF800000> : vector<9xf32>
    %133 = vector.multi_reduction <maximumf>, %132, %cst_55 [1] : vector<9x9xf32> to vector<9xf32>
    %134 = vector.shape_cast %133 : vector<9xf32> to vector<9x1xf32>
    %135 = vector.broadcast %134 : vector<9x1xf32> to vector<9x9xf32>
    %136 = arith.subf %132, %135 : vector<9x9xf32>
    %137 = math.exp %136 : vector<9x9xf32>
    %cst_56 = arith.constant dense<0.000000e+00> : vector<9xf32>
    %138 = vector.multi_reduction <add>, %137, %cst_56 [1] : vector<9x9xf32> to vector<9xf32>
    %139 = vector.shape_cast %138 : vector<9xf32> to vector<9x1xf32>
    %140 = tpu.reciprocal %139 {approx = true} : vector<9x1xf32> -> vector<9x1xf32>
    %141 = vector.broadcast %140 : vector<9x1xf32> to vector<9x9xf32>
    %142 = arith.mulf %137, %141 : vector<9x9xf32>
    %cst_57 = arith.constant dense<0.000000e+00> : vector<9x16xf32>
    %143 = tpu.matmul %142, %129, %cst_57 {dimension_numbers = #tpu.dot_dimension_numbers<[1], [0], [0], [1], [0, 0, 1, 1], [], []>} : vector<9x9xf32>, vector<9x16xf32>, vector<9x16xf32> -> vector<9x16xf32>
    %144 = vector.extract_strided_slice %54 {offsets = [0, 80], sizes = [9, 16], strides = [1, 1]} : vector<9x128xf32> to vector<9x16xf32>
    %145 = vector.extract_strided_slice %55 {offsets = [0, 80], sizes = [9, 16], strides = [1, 1]} : vector<9x128xf32> to vector<9x16xf32>
    %146 = vector.extract_strided_slice %56 {offsets = [0, 80], sizes = [9, 16], strides = [1, 1]} : vector<9x128xf32> to vector<9x16xf32>
    %cst_58 = arith.constant dense<0.000000e+00> : vector<9x9xf32>
    %147 = tpu.matmul %144, %145, %cst_58 {dimension_numbers = #tpu.dot_dimension_numbers<[1], [1], [0], [0], [0, 0, 1, 0], [], []>} : vector<9x16xf32>, vector<9x16xf32>, vector<9x9xf32> -> vector<9x9xf32>
    %148 = vector.broadcast %58 : vector<1x9xf32> to vector<9x9xf32>
    %149 = arith.addf %147, %148 : vector<9x9xf32>
    %cst_59 = arith.constant dense<0xFF800000> : vector<9xf32>
    %150 = vector.multi_reduction <maximumf>, %149, %cst_59 [1] : vector<9x9xf32> to vector<9xf32>
    %151 = vector.shape_cast %150 : vector<9xf32> to vector<9x1xf32>
    %152 = vector.broadcast %151 : vector<9x1xf32> to vector<9x9xf32>
    %153 = arith.subf %149, %152 : vector<9x9xf32>
    %154 = math.exp %153 : vector<9x9xf32>
    %cst_60 = arith.constant dense<0.000000e+00> : vector<9xf32>
    %155 = vector.multi_reduction <add>, %154, %cst_60 [1] : vector<9x9xf32> to vector<9xf32>
    %156 = vector.shape_cast %155 : vector<9xf32> to vector<9x1xf32>
    %157 = tpu.reciprocal %156 {approx = true} : vector<9x1xf32> -> vector<9x1xf32>
    %158 = vector.broadcast %157 : vector<9x1xf32> to vector<9x9xf32>
    %159 = arith.mulf %154, %158 : vector<9x9xf32>
    %cst_61 = arith.constant dense<0.000000e+00> : vector<9x16xf32>
    %160 = tpu.matmul %159, %146, %cst_61 {dimension_numbers = #tpu.dot_dimension_numbers<[1], [0], [0], [1], [0, 0, 1, 1], [], []>} : vector<9x9xf32>, vector<9x16xf32>, vector<9x16xf32> -> vector<9x16xf32>
    %161 = vector.extract_strided_slice %54 {offsets = [0, 96], sizes = [9, 16], strides = [1, 1]} : vector<9x128xf32> to vector<9x16xf32>
    %162 = vector.extract_strided_slice %55 {offsets = [0, 96], sizes = [9, 16], strides = [1, 1]} : vector<9x128xf32> to vector<9x16xf32>
    %163 = vector.extract_strided_slice %56 {offsets = [0, 96], sizes = [9, 16], strides = [1, 1]} : vector<9x128xf32> to vector<9x16xf32>
    %cst_62 = arith.constant dense<0.000000e+00> : vector<9x9xf32>
    %164 = tpu.matmul %161, %162, %cst_62 {dimension_numbers = #tpu.dot_dimension_numbers<[1], [1], [0], [0], [0, 0, 1, 0], [], []>} : vector<9x16xf32>, vector<9x16xf32>, vector<9x9xf32> -> vector<9x9xf32>
    %165 = vector.broadcast %58 : vector<1x9xf32> to vector<9x9xf32>
    %166 = arith.addf %164, %165 : vector<9x9xf32>
    %cst_63 = arith.constant dense<0xFF800000> : vector<9xf32>
    %167 = vector.multi_reduction <maximumf>, %166, %cst_63 [1] : vector<9x9xf32> to vector<9xf32>
    %168 = vector.shape_cast %167 : vector<9xf32> to vector<9x1xf32>
    %169 = vector.broadcast %168 : vector<9x1xf32> to vector<9x9xf32>
    %170 = arith.subf %166, %169 : vector<9x9xf32>
    %171 = math.exp %170 : vector<9x9xf32>
    %cst_64 = arith.constant dense<0.000000e+00> : vector<9xf32>
    %172 = vector.multi_reduction <add>, %171, %cst_64 [1] : vector<9x9xf32> to vector<9xf32>
    %173 = vector.shape_cast %172 : vector<9xf32> to vector<9x1xf32>
    %174 = tpu.reciprocal %173 {approx = true} : vector<9x1xf32> -> vector<9x1xf32>
    %175 = vector.broadcast %174 : vector<9x1xf32> to vector<9x9xf32>
    %176 = arith.mulf %171, %175 : vector<9x9xf32>
    %cst_65 = arith.constant dense<0.000000e+00> : vector<9x16xf32>
    %177 = tpu.matmul %176, %163, %cst_65 {dimension_numbers = #tpu.dot_dimension_numbers<[1], [0], [0], [1], [0, 0, 1, 1], [], []>} : vector<9x9xf32>, vector<9x16xf32>, vector<9x16xf32> -> vector<9x16xf32>
    %178 = vector.extract_strided_slice %54 {offsets = [0, 112], sizes = [9, 16], strides = [1, 1]} : vector<9x128xf32> to vector<9x16xf32>
    %179 = vector.extract_strided_slice %55 {offsets = [0, 112], sizes = [9, 16], strides = [1, 1]} : vector<9x128xf32> to vector<9x16xf32>
    %180 = vector.extract_strided_slice %56 {offsets = [0, 112], sizes = [9, 16], strides = [1, 1]} : vector<9x128xf32> to vector<9x16xf32>
    %cst_66 = arith.constant dense<0.000000e+00> : vector<9x9xf32>
    %181 = tpu.matmul %178, %179, %cst_66 {dimension_numbers = #tpu.dot_dimension_numbers<[1], [1], [0], [0], [0, 0, 1, 0], [], []>} : vector<9x16xf32>, vector<9x16xf32>, vector<9x9xf32> -> vector<9x9xf32>
    %182 = vector.broadcast %58 : vector<1x9xf32> to vector<9x9xf32>
    %183 = arith.addf %181, %182 : vector<9x9xf32>
    %cst_67 = arith.constant dense<0xFF800000> : vector<9xf32>
    %184 = vector.multi_reduction <maximumf>, %183, %cst_67 [1] : vector<9x9xf32> to vector<9xf32>
    %185 = vector.shape_cast %184 : vector<9xf32> to vector<9x1xf32>
    %186 = vector.broadcast %185 : vector<9x1xf32> to vector<9x9xf32>
    %187 = arith.subf %183, %186 : vector<9x9xf32>
    %188 = math.exp %187 : vector<9x9xf32>
    %cst_68 = arith.constant dense<0.000000e+00> : vector<9xf32>
    %189 = vector.multi_reduction <add>, %188, %cst_68 [1] : vector<9x9xf32> to vector<9xf32>
    %190 = vector.shape_cast %189 : vector<9xf32> to vector<9x1xf32>
    %191 = tpu.reciprocal %190 {approx = true} : vector<9x1xf32> -> vector<9x1xf32>
    %192 = vector.broadcast %191 : vector<9x1xf32> to vector<9x9xf32>
    %193 = arith.mulf %188, %192 : vector<9x9xf32>
    %cst_69 = arith.constant dense<0.000000e+00> : vector<9x16xf32>
    %194 = tpu.matmul %193, %180, %cst_69 {dimension_numbers = #tpu.dot_dimension_numbers<[1], [0], [0], [1], [0, 0, 1, 1], [], []>} : vector<9x9xf32>, vector<9x16xf32>, vector<9x16xf32> -> vector<9x16xf32>
    %195 = tpu.concatenate %75, %92, %109, %126, %143, %160, %177, %194 in 1 : vector<9x16xf32>, vector<9x16xf32>, vector<9x16xf32>, vector<9x16xf32>, vector<9x16xf32>, vector<9x16xf32>, vector<9x16xf32>, vector<9x16xf32> -> vector<9x128xf32>
    %196 = arith.truncf %195 : vector<9x128xf32> to vector<9x128xbf16>
    %c0_70 = arith.constant 0 : index
    %c0_71 = arith.constant 0 : index
    %197 = vector.load %arg16[%c0_70, %c0_71] : memref<128x128xbf16, #tpu.memory_space<vmem>>, vector<128x128xbf16>
    %cst_72 = arith.constant dense<0.000000e+00> : vector<9x128xf32>
    %198 = tpu.matmul %196, %197, %cst_72 {dimension_numbers = #tpu.dot_dimension_numbers<[1], [0], [0], [1], [0, 0, 1, 1], [], []>} : vector<9x128xbf16>, vector<128x128xbf16>, vector<9x128xf32> -> vector<9x128xf32>
    %c0_73 = arith.constant 0 : index
    %c0_74 = arith.constant 0 : index
    %199 = vector.load %arg17[%c0_73, %c0_74] : memref<1x128xf32, #tpu.memory_space<vmem>>, vector<1x128xf32>
    %200 = vector.broadcast %199 : vector<1x128xf32> to vector<9x128xf32>
    %201 = arith.addf %198, %200 : vector<9x128xf32>
    %202 = arith.addf %45, %201 : vector<9x128xf32>
    %c0_75 = arith.constant 0 : index
    %c0_76 = arith.constant 0 : index
    %203 = vector.load %arg18[%c0_75, %c0_76] : memref<1x128xf32, #tpu.memory_space<vmem>>, vector<1x128xf32>
    %c0_77 = arith.constant 0 : index
    %c0_78 = arith.constant 0 : index
    %204 = vector.load %arg19[%c0_77, %c0_78] : memref<1x128xf32, #tpu.memory_space<vmem>>, vector<1x128xf32>
    %cst_79 = arith.constant dense<0.000000e+00> : vector<9xf32>
    %205 = vector.multi_reduction <add>, %202, %cst_79 [1] : vector<9x128xf32> to vector<9xf32>
    %206 = vector.shape_cast %205 : vector<9xf32> to vector<9x1xf32>
    %cst_80 = arith.constant 1.280000e+02 : f32
    %207 = vector.broadcast %cst_80 : f32 to vector<9x1xf32>
    %208 = arith.divf %206, %207 : vector<9x1xf32>
    %209 = vector.broadcast %208 : vector<9x1xf32> to vector<9x128xf32>
    %210 = arith.subf %202, %209 : vector<9x128xf32>
    %211 = vector.broadcast %208 : vector<9x1xf32> to vector<9x128xf32>
    %212 = arith.subf %202, %211 : vector<9x128xf32>
    %213 = arith.mulf %210, %212 : vector<9x128xf32>
    %cst_81 = arith.constant dense<0.000000e+00> : vector<9xf32>
    %214 = vector.multi_reduction <add>, %213, %cst_81 [1] : vector<9x128xf32> to vector<9xf32>
    %215 = vector.shape_cast %214 : vector<9xf32> to vector<9x1xf32>
    %cst_82 = arith.constant 1.280000e+02 : f32
    %216 = vector.broadcast %cst_82 : f32 to vector<9x1xf32>
    %217 = arith.divf %215, %216 : vector<9x1xf32>
    %218 = vector.broadcast %208 : vector<9x1xf32> to vector<9x128xf32>
    %219 = arith.subf %202, %218 : vector<9x128xf32>
    %cst_83 = arith.constant 9.99999974E-6 : f32
    %220 = vector.broadcast %cst_83 : f32 to vector<9x1xf32>
    %221 = arith.addf %217, %220 : vector<9x1xf32>
    %222 = math.rsqrt %221 : vector<9x1xf32>
    %223 = vector.broadcast %222 : vector<9x1xf32> to vector<9x128xf32>
    %224 = arith.mulf %219, %223 : vector<9x128xf32>
    %225 = vector.broadcast %203 : vector<1x128xf32> to vector<9x128xf32>
    %226 = arith.mulf %224, %225 : vector<9x128xf32>
    %227 = vector.broadcast %204 : vector<1x128xf32> to vector<9x128xf32>
    %228 = arith.addf %226, %227 : vector<9x128xf32>
    %229 = arith.truncf %228 : vector<9x128xf32> to vector<9x128xbf16>
    %c0_84 = arith.constant 0 : index
    %c0_85 = arith.constant 0 : index
    %230 = vector.load %arg20[%c0_84, %c0_85] : memref<128x256xbf16, #tpu.memory_space<vmem>>, vector<128x256xbf16>
    %cst_86 = arith.constant dense<0.000000e+00> : vector<9x256xf32>
    %231 = tpu.matmul %229, %230, %cst_86 {dimension_numbers = #tpu.dot_dimension_numbers<[1], [0], [0], [1], [0, 0, 1, 1], [], []>} : vector<9x128xbf16>, vector<128x256xbf16>, vector<9x256xf32> -> vector<9x256xf32>
    %c0_87 = arith.constant 0 : index
    %c0_88 = arith.constant 0 : index
    %232 = vector.load %arg21[%c0_87, %c0_88] : memref<1x256xf32, #tpu.memory_space<vmem>>, vector<1x256xf32>
    %233 = vector.broadcast %232 : vector<1x256xf32> to vector<9x256xf32>
    %234 = arith.addf %231, %233 : vector<9x256xf32>
    %cst_89 = arith.constant 0.000000e+00 : f32
    %235 = vector.broadcast %cst_89 : f32 to vector<9x256xf32>
    %236 = arith.maximumf %234, %235 : vector<9x256xf32>
    %237 = arith.truncf %236 : vector<9x256xf32> to vector<9x256xbf16>
    %c0_90 = arith.constant 0 : index
    %c0_91 = arith.constant 0 : index
    %238 = vector.load %arg22[%c0_90, %c0_91] : memref<256x128xbf16, #tpu.memory_space<vmem>>, vector<256x128xbf16>
    %cst_92 = arith.constant dense<0.000000e+00> : vector<9x128xf32>
    %239 = tpu.matmul %237, %238, %cst_92 {dimension_numbers = #tpu.dot_dimension_numbers<[1], [0], [0], [1], [0, 0, 1, 1], [], []>} : vector<9x256xbf16>, vector<256x128xbf16>, vector<9x128xf32> -> vector<9x128xf32>
    %c0_93 = arith.constant 0 : index
    %c0_94 = arith.constant 0 : index
    %240 = vector.load %arg23[%c0_93, %c0_94] : memref<1x128xf32, #tpu.memory_space<vmem>>, vector<1x128xf32>
    %241 = vector.broadcast %240 : vector<1x128xf32> to vector<9x128xf32>
    %242 = arith.addf %239, %241 : vector<9x128xf32>
    %243 = arith.addf %228, %242 : vector<9x128xf32>
    %c0_95 = arith.constant 0 : index
    %c0_96 = arith.constant 0 : index
    %244 = vector.load %arg24[%c0_95, %c0_96] : memref<1x128xf32, #tpu.memory_space<vmem>>, vector<1x128xf32>
    %c0_97 = arith.constant 0 : index
    %c0_98 = arith.constant 0 : index
    %245 = vector.load %arg25[%c0_97, %c0_98] : memref<1x128xf32, #tpu.memory_space<vmem>>, vector<1x128xf32>
    %cst_99 = arith.constant dense<0.000000e+00> : vector<9xf32>
    %246 = vector.multi_reduction <add>, %243, %cst_99 [1] : vector<9x128xf32> to vector<9xf32>
    %247 = vector.shape_cast %246 : vector<9xf32> to vector<9x1xf32>
    %cst_100 = arith.constant 1.280000e+02 : f32
    %248 = vector.broadcast %cst_100 : f32 to vector<9x1xf32>
    %249 = arith.divf %247, %248 : vector<9x1xf32>
    %250 = vector.broadcast %249 : vector<9x1xf32> to vector<9x128xf32>
    %251 = arith.subf %243, %250 : vector<9x128xf32>
    %252 = vector.broadcast %249 : vector<9x1xf32> to vector<9x128xf32>
    %253 = arith.subf %243, %252 : vector<9x128xf32>
    %254 = arith.mulf %251, %253 : vector<9x128xf32>
    %cst_101 = arith.constant dense<0.000000e+00> : vector<9xf32>
    %255 = vector.multi_reduction <add>, %254, %cst_101 [1] : vector<9x128xf32> to vector<9xf32>
    %256 = vector.shape_cast %255 : vector<9xf32> to vector<9x1xf32>
    %cst_102 = arith.constant 1.280000e+02 : f32
    %257 = vector.broadcast %cst_102 : f32 to vector<9x1xf32>
    %258 = arith.divf %256, %257 : vector<9x1xf32>
    %259 = vector.broadcast %249 : vector<9x1xf32> to vector<9x128xf32>
    %260 = arith.subf %243, %259 : vector<9x128xf32>
    %cst_103 = arith.constant 9.99999974E-6 : f32
    %261 = vector.broadcast %cst_103 : f32 to vector<9x1xf32>
    %262 = arith.addf %258, %261 : vector<9x1xf32>
    %263 = math.rsqrt %262 : vector<9x1xf32>
    %264 = vector.broadcast %263 : vector<9x1xf32> to vector<9x128xf32>
    %265 = arith.mulf %260, %264 : vector<9x128xf32>
    %266 = vector.broadcast %244 : vector<1x128xf32> to vector<9x128xf32>
    %267 = arith.mulf %265, %266 : vector<9x128xf32>
    %268 = vector.broadcast %245 : vector<1x128xf32> to vector<9x128xf32>
    %269 = arith.addf %267, %268 : vector<9x128xf32>
    %c0_104 = arith.constant 0 : index
    %c0_105 = arith.constant 0 : index
    %c0_106 = arith.constant 0 : index
    %270 = vector.load %arg26[%c0_104, %c0_105, %c0_106] : memref<1x9x128xf32, #tpu.memory_space<vmem>>, vector<1x9x128xf32>
    %271 = vector.shape_cast %270 : vector<1x9x128xf32> to vector<9x128xf32>
    %272 = vector.shape_cast %269 : vector<9x128xf32> to vector<1x9x128xf32>
    tpu.vector_store %arg26[%c0_104, %c0_105, %c0_106], %272 {strides = array<i32>} : memref<1x9x128xf32, #tpu.memory_space<vmem>>, vector<1x9x128xf32>,
    return
  }
  func.func @transform_0(%arg0: i32) -> (i32, i32, i32) {
    %c0_i32 = arith.constant 0 : i32
    %c0_i32_0 = arith.constant 0 : i32
    %c0_i32_1 = arith.constant 0 : i32
    return %arg0, %c0_i32, %c0_i32_0 : i32, i32, i32
  }
  func.func @transform_1(%arg0: i32) -> (i32, i32, i32) {
    %c0_i32 = arith.constant 0 : i32
    %c0_i32_0 = arith.constant 0 : i32
    %c0_i32_1 = arith.constant 0 : i32
    return %arg0, %c0_i32, %c0_i32_0 : i32, i32, i32
  }
  func.func @transform_2(%arg0: i32) -> (i32, i32) {
    %c0_i32 = arith.constant 0 : i32
    %c0_i32_0 = arith.constant 0 : i32
    %c0_i32_1 = arith.constant 0 : i32
    return %c0_i32, %c0_i32_0 : i32, i32
  }
  func.func @transform_3(%arg0: i32) -> (i32, i32) {
    %c0_i32 = arith.constant 0 : i32
    %c0_i32_0 = arith.constant 0 : i32
    %c0_i32_1 = arith.constant 0 : i32
    return %c0_i32, %c0_i32_0 : i32, i32
  }
  func.func @transform_4(%arg0: i32) -> (i32, i32) {
    %c0_i32 = arith.constant 0 : i32
    %c0_i32_0 = arith.constant 0 : i32
    %c0_i32_1 = arith.constant 0 : i32
    return %c0_i32, %c0_i32_0 : i32, i32
  }
  func.func @transform_5(%arg0: i32) -> (i32, i32) {
    %c0_i32 = arith.constant 0 : i32
    %c0_i32_0 = arith.constant 0 : i32
    %c0_i32_1 = arith.constant 0 : i32
    return %c0_i32, %c0_i32_0 : i32, i32
  }
  func.func @transform_6(%arg0: i32) -> (i32, i32) {
    %c0_i32 = arith.constant 0 : i32
    %c0_i32_0 = arith.constant 0 : i32
    %c0_i32_1 = arith.constant 0 : i32
    return %c0_i32, %c0_i32_0 : i32, i32
  }
  func.func @transform_7(%arg0: i32) -> (i32, i32) {
    %c0_i32 = arith.constant 0 : i32
    %c0_i32_0 = arith.constant 0 : i32
    %c0_i32_1 = arith.constant 0 : i32
    return %c0_i32, %c0_i32_0 : i32, i32
  }
  func.func @transform_8(%arg0: i32) -> (i32, i32) {
    %c0_i32 = arith.constant 0 : i32
    %c0_i32_0 = arith.constant 0 : i32
    %c0_i32_1 = arith.constant 0 : i32
    return %c0_i32, %c0_i32_0 : i32, i32
  }
  func.func @transform_9(%arg0: i32) -> (i32, i32) {
    %c0_i32 = arith.constant 0 : i32
    %c0_i32_0 = arith.constant 0 : i32
    %c0_i32_1 = arith.constant 0 : i32
    return %c0_i32, %c0_i32_0 : i32, i32
  }
  func.func @transform_10(%arg0: i32) -> (i32, i32) {
    %c0_i32 = arith.constant 0 : i32
    %c0_i32_0 = arith.constant 0 : i32
    %c0_i32_1 = arith.constant 0 : i32
    return %c0_i32, %c0_i32_0 : i32, i32
  }
  func.func @transform_11(%arg0: i32) -> (i32, i32) {
    %c0_i32 = arith.constant 0 : i32
    %c0_i32_0 = arith.constant 0 : i32
    %c0_i32_1 = arith.constant 0 : i32
    return %c0_i32, %c0_i32_0 : i32, i32
  }
  func.func @transform_12(%arg0: i32) -> (i32, i32) {
    %c0_i32 = arith.constant 0 : i32
    %c0_i32_0 = arith.constant 0 : i32
    %c0_i32_1 = arith.constant 0 : i32
    return %c0_i32, %c0_i32_0 : i32, i32
  }
  func.func @transform_13(%arg0: i32) -> (i32, i32) {
    %c0_i32 = arith.constant 0 : i32
    %c0_i32_0 = arith.constant 0 : i32
    %c0_i32_1 = arith.constant 0 : i32
    return %c0_i32, %c0_i32_0 : i32, i32
  }
  func.func @transform_14(%arg0: i32) -> (i32, i32) {
    %c0_i32 = arith.constant 0 : i32
    %c0_i32_0 = arith.constant 0 : i32
    %c0_i32_1 = arith.constant 0 : i32
    return %c0_i32, %c0_i32_0 : i32, i32
  }
  func.func @transform_15(%arg0: i32) -> (i32, i32) {
    %c0_i32 = arith.constant 0 : i32
    %c0_i32_0 = arith.constant 0 : i32
    %c0_i32_1 = arith.constant 0 : i32
    return %c0_i32, %c0_i32_0 : i32, i32
  }
  func.func @transform_16(%arg0: i32) -> (i32, i32) {
    %c0_i32 = arith.constant 0 : i32
    %c0_i32_0 = arith.constant 0 : i32
    %c0_i32_1 = arith.constant 0 : i32
    return %c0_i32, %c0_i32_0 : i32, i32
  }
  func.func @transform_17(%arg0: i32) -> (i32, i32) {
    %c0_i32 = arith.constant 0 : i32
    %c0_i32_0 = arith.constant 0 : i32
    %c0_i32_1 = arith.constant 0 : i32
    return %c0_i32, %c0_i32_0 : i32, i32
  }
  func.func @transform_18(%arg0: i32) -> (i32, i32) {
    %c0_i32 = arith.constant 0 : i32
    %c0_i32_0 = arith.constant 0 : i32
    %c0_i32_1 = arith.constant 0 : i32
    return %c0_i32, %c0_i32_0 : i32, i32
  }
  func.func @transform_19(%arg0: i32) -> (i32, i32) {
    %c0_i32 = arith.constant 0 : i32
    %c0_i32_0 = arith.constant 0 : i32
    %c0_i32_1 = arith.constant 0 : i32
    return %c0_i32, %c0_i32_0 : i32, i32
  }
  func.func @transform_20(%arg0: i32) -> (i32, i32) {
    %c0_i32 = arith.constant 0 : i32
    %c0_i32_0 = arith.constant 0 : i32
    %c0_i32_1 = arith.constant 0 : i32
    return %c0_i32, %c0_i32_0 : i32, i32
  }
  func.func @transform_21(%arg0: i32) -> (i32, i32) {
    %c0_i32 = arith.constant 0 : i32
    %c0_i32_0 = arith.constant 0 : i32
    %c0_i32_1 = arith.constant 0 : i32
    return %c0_i32, %c0_i32_0 : i32, i32
  }
  func.func @transform_22(%arg0: i32) -> (i32, i32) {
    %c0_i32 = arith.constant 0 : i32
    %c0_i32_0 = arith.constant 0 : i32
    %c0_i32_1 = arith.constant 0 : i32
    return %c0_i32, %c0_i32_0 : i32, i32
  }
  func.func @transform_23(%arg0: i32) -> (i32, i32) {
    %c0_i32 = arith.constant 0 : i32
    %c0_i32_0 = arith.constant 0 : i32
    %c0_i32_1 = arith.constant 0 : i32
    return %c0_i32, %c0_i32_0 : i32, i32
  }
  func.func @transform_24(%arg0: i32) -> (i32, i32) {
    %c0_i32 = arith.constant 0 : i32
    %c0_i32_0 = arith.constant 0 : i32
    %c0_i32_1 = arith.constant 0 : i32
    return %c0_i32, %c0_i32_0 : i32, i32
  }
  func.func @transform_25(%arg0: i32) -> (i32, i32, i32) {
    %c0_i32 = arith.constant 0 : i32
    %c0_i32_0 = arith.constant 0 : i32
    %c0_i32_1 = arith.constant 0 : i32
    return %arg0, %c0_i32, %c0_i32_0 : i32, i32, i32
  }
}

</mosaic_0001>

<bundles_post_ra>
// kernel: transformer_encoder_forward.1
= control target key start
LH: loop header
LB: loop body
LE: loop exit
PB: predicated region body
PF: predicated region fallthrough
CT: control target
= control target key end

     0   :  { %s5115_s0 = inlined_call_operand.vmem [shape: f32[2,8,2], index: 0, kind: input, shape index: {}]   ;;  %s5116_s1 = inlined_call_operand.vmem [shape: f32[2,1,9], index: 1, kind: input, shape index: {}]   ;;  %s5117_s2 = inlined_call_operand.vmem [shape: f32[1,64], index: 2, kind: input, shape index: {}]   ;;  %s5118_s3 = inlined_call_operand.hbm [shape: bf16[128,128], index: 3, kind: input, shape index: {}]   ;;  %s5119_s4 = inlined_call_operand.vmem [shape: f32[1,128], index: 4, kind: input, shape index: {}]   ;;  %s5120_s5 = inlined_call_operand.hbm [shape: bf16[128,128], index: 5, kind: input, shape index: {}]   ;;  %s5121_s6 = inlined_call_operand.vmem [shape: f32[1,128], index: 6, kind: input, shape index: {}]   ;;  %s5122_s7 = inlined_call_operand.hbm [shape: bf16[128,128], index: 7, kind: input, shape index: {}]   ;;  %s5123_s8 = inlined_call_operand.vmem [shape: f32[1,128], index: 8, kind: input, shape index: {}]   ;;  %s5124_s9 = inlined_call_operand.vmem [shape: f32[1,128], index: 9, kind: input, shape index: {}]   ;;  %s5125_s10 = inlined_call_operand.hbm [shape: bf16[128,128], index: 10, kind: input, shape index: {}]   ;;  %s5126_s11 = inlined_call_operand.vmem [shape: f32[1,128], index: 11, kind: input, shape index: {}]   ;;  %s5127_s12 = inlined_call_operand.vmem [shape: f32[1,128], index: 12, kind: input, shape index: {}]   ;;  %s5128_s13 = inlined_call_operand.hbm [shape: bf16[128,384], index: 13, kind: input, shape index: {}]   ;;  %s5129_s14 = inlined_call_operand.vmem [shape: f32[1,384], index: 14, kind: input, shape index: {}]   ;;  %s5130_s15 = inlined_call_operand.hbm [shape: bf16[128,128], index: 15, kind: input, shape index: {}]   ;;  %s5131_s16 = inlined_call_operand.vmem [shape: f32[1,128], index: 16, kind: input, shape index: {}]   ;;  %s5132_s17 = inlined_call_operand.vmem [shape: f32[1,128], index: 17, kind: input, shape index: {}]   ;;  %s5133_s18 = inlined_call_operand.vmem [shape: f32[1,128], index: 18, kind: input, shape index: {}]   ;;  %s5134_s19 = inlined_call_operand.hbm [shape: bf16[128,256], index: 19, kind: input, shape index: {}]   ;;  %s5135_s20 = inlined_call_operand.vmem [shape: f32[1,256], index: 20, kind: input, shape index: {}]   ;;  %s5136_s21 = inlined_call_operand.hbm [shape: bf16[256,128], index: 21, kind: input, shape index: {}]   ;;  %s5137_s22 = inlined_call_operand.vmem [shape: f32[1,128], index: 22, kind: input, shape index: {}]   ;;  %s5138_s23 = inlined_call_operand.vmem [shape: f32[1,128], index: 23, kind: input, shape index: {}]   ;;  %s5139_s24 = inlined_call_operand.vmem [shape: f32[1,128], index: 24, kind: input, shape index: {}]   ;;  %s5140_s25 = inlined_call_operand.vmem [shape: f32[2,9,128], index: 25, kind: output, shape index: {}]  }
   0x1   :  { %5143 = sst [smem:[#allocation21_spill]] %s5115_s0 }
   0x2   :  { %5144 = sst [smem:[#allocation22_spill]] %s5116_s1 }
   0x3   :  { %5145 = sst [smem:[#allocation23_spill]] %s5117_s2 }
   0x4   :  { %5146 = sst [smem:[#allocation24_spill]] %s5118_s3 }
   0x5   :  { %5147 = sst [smem:[#allocation25_spill]] %s5119_s4 }
   0x6   :  { %5148 = sst [smem:[#allocation26_spill]] %s5120_s5 }
   0x7   :  { %5149 = sst [smem:[#allocation27_spill]] %s5121_s6 }
   0x8   :  { %5150 = sst [smem:[#allocation28_spill]] %s5122_s7 }
   0x9   :  { %5151 = sst [smem:[#allocation29_spill]] %s5123_s8 }
   0xa   :  { %5152 = sst [smem:[#allocation30_spill]] %s5124_s9 }
   0xb   :  { %5153 = sst [smem:[#allocation31_spill]] %s5125_s10 }
   0xc   :  { %5154 = sst [smem:[#allocation32_spill]] %s5128_s13 }
   0xd   :  { %5155 = sst [smem:[#allocation33_spill]] %s5130_s15 }
   0xe   :  { %5156 = sst [smem:[#allocation34_spill]] %s5140_s25 }
   0xf   :  { %30 = vsyncpa [#allocation3], 0 }
  0x10   :  { %31 = vsyncpa [#allocation5], 0 }
  0x11   :  { %32 = vsyncpa [#allocation8], 0 }
  0x12   :  { %33 = vsyncpa [#allocation11], 0 }
  0x13   :  { %34 = vsyncpa [#allocation14], 0  ;;  %s4522_s29 = smov 0  }
  0x14 LB: > { %5157 = sst [smem:[#allocation20_spill]] %s4360_s29  ;;  %s4528_s2 = sadd.s32 4294967295, %s4360_s29   ;;  %s4360_s29 = sphi %s4522_s29, %s40_s29  }
  0x15   : > { %p3291_p0 = scmp.ge.s32.totalorder %s4360_s29, 1  ;;  %p606_p1 = scmp.lt.s32.totalorder %s4360_s29, 3 }
  0x16   : > { %p3915_p2 = scmp.eq.s32.totalorder %s4528_s2, 0  ;;  %s5158_s7 = sld [smem:[#allocation26_spill]] }
  0x17   : > { %p4536_p3 = pnand %p3291_p0, %p606_p1  ;;  %s5160_s10 = sld [smem:[#allocation31_spill]] }
  0x18   : > { %s4362_s4 = smov [#allocation4]   ;;  %s4363_s5 = smov [#allocation7]  }
  0x19   : > { %p3890_p4 = pneg %p4536_p3  ;;  %s639_s28 = sshll.u32 %s4362_s4, 4  ;;  %s640_s28 = int_to_ptr.vmem [resolvable:$true] %s639_s28 }
  0x1a   : > { %s676_s0 = sshll.u32 %s4363_s5, 4  ;;  %s5162_s15 = sld [smem:[#allocation33_spill]]  ;;  %s677_s0 = int_to_ptr.vmem [resolvable:$true] %s676_s0 }
  0x1b   : > { %p4547_p5 = pnand %p3915_p2, %p3890_p4  ;;  %s4364_s1 = smov 64  }
  0x1c   : > { %s637_s3 = sshll.u32 %s5158_s7, 4  ;;  %s4365_s8 = smov 4   ;;  %s638_s3 = int_to_ptr.hbm [resolvable:$true] %s637_s3 }
  0x1d   : > { %s674_s27 = sshll.u32 %s5160_s10, 4  ;;  %s4366_s4 = smov [#allocation10]   ;;  %s675_s27 = int_to_ptr.hbm [resolvable:$true] %s674_s27 }
  0x1e   : > { %3896 = dma.hbm_to_vmem [thread:$0]  (!%p4547_p5), %s638_s3, 1024, %s640_s28, [#allocation5], %s4364_s1, %s4364_s1, %s4365_s8  }
  0x1f   : > { %3902 = dma.hbm_to_vmem [thread:$0]  (!%p4547_p5), %s675_s27, 1024, %s677_s0, [#allocation8], %s4364_s1, %s4364_s1, %s4365_s8  }
  0x20   : > { %s711_s7 = sshll.u32 %s5162_s15, 4  ;;  %s713_s5 = sshll.u32 %s4366_s4, 4  ;;  %s712_s7 = int_to_ptr.hbm [resolvable:$true] %s711_s7  ;;  %s714_s5 = int_to_ptr.vmem [resolvable:$true] %s713_s5 }
  0x21   : > { %s5163_s30 = sld [smem:[#allocation24_spill]]  ;;  %s4367_s27 = smov [#allocation2]  }
  0x22   : > { %3908 = dma.hbm_to_vmem [thread:$0]  (!%p4547_p5), %s712_s7, 1024, %s714_s5, [#allocation11], %s4364_s1, %s4364_s1, %s4365_s8  }
  0x23   : > { %s5164_s29 = sld [smem:[#allocation28_spill]]  ;;  %s622_s0 = sshll.u32 %s4367_s27, 4  ;;  %s623_s0 = int_to_ptr.vmem [resolvable:$true] %s622_s0 }
  0x24   : > { %s4368_s10 = smov [#allocation6]   ;;  %s5165_s13 = sld [smem:[#allocation32_spill]] }
  0x25   : > { %s656_s4 = sshll.u32 %s4368_s10, 4  ;;  %s4370_s27 = smov 192   ;;  %s657_s4 = int_to_ptr.vmem [resolvable:$true] %s656_s4 }
  0x26   : > { %s4372_s10 = smov [#allocation12]   ;;  %s4375_s3 = smov [#allocation13]  }
  0x27   : > { %s620_s15 = sshll.u32 %s5163_s30, 4  ;;  %s736_s6 = sshll.u32 %s4372_s10, 4  ;;  %s621_s15 = int_to_ptr.hbm [resolvable:$true] %s620_s15  ;;  %s737_s6 = int_to_ptr.vmem [resolvable:$true] %s736_s6 }
  0x28   : > { %3893 = dma.hbm_to_vmem [thread:$0]  (!%p4547_p5), %s621_s15, 1024, %s623_s0, [#allocation3], %s4364_s1, %s4364_s1, %s4365_s8  }
  0x29   : > { %s654_s25 = sshll.u32 %s5164_s29, 4  ;;  %s4369_s29 = smov [#allocation9]   ;;  %s655_s25 = int_to_ptr.hbm [resolvable:$true] %s654_s25 }
  0x2a   : > { %s694_s7 = sshll.u32 %s5165_s13, 4  ;;  %s696_s5 = sshll.u32 %s4369_s29, 4  ;;  %s695_s7 = int_to_ptr.hbm [resolvable:$true] %s694_s7  ;;  %s697_s5 = int_to_ptr.vmem [resolvable:$true] %s696_s5 }
  0x2b   : > { %3899 = dma.hbm_to_vmem [thread:$0]  (!%p4547_p5), %s655_s25, 1024, %s657_s4, [#allocation5], %s4364_s1, %s4364_s1, %s4365_s8  }
  0x2c   : > { %s734_s15 = sshll.u32 %s5134_s19, 4  ;;  %s4371_s0 = smov 12   ;;  %s735_s15 = int_to_ptr.hbm [resolvable:$true] %s734_s15 }
  0x2d   : > { %3905 = dma.hbm_to_vmem [thread:$0]  (!%p4547_p5), %s695_s7, 3072, %s697_s5, [#allocation8], %s4370_s27, %s4370_s27, %s4371_s0  }
  0x2e   : > { %s4373_s30 = smov 128   ;;  %s4374_s13 = smov 8  }
  0x2f   : > { %3911 = dma.hbm_to_vmem [thread:$0]  (!%p4547_p5), %s735_s15, 2048, %s737_s6, [#allocation11], %s4373_s30, %s4373_s30, %s4374_s13  }
  0x30   : > { %s751_s29 = sshll.u32 %s5136_s21, 4  ;;  %s753_s28 = sshll.u32 %s4375_s3, 4  ;;  %s752_s29 = int_to_ptr.hbm [resolvable:$true] %s751_s29  ;;  %s754_s28 = int_to_ptr.vmem [resolvable:$true] %s753_s28 }
  0x31   : > { %3914 = dma.hbm_to_vmem [thread:$0]  (!%p4547_p5), %s752_s29, 2048, %s754_s28, [#allocation14], %s4364_s1, %s4364_s1, %s4365_s8  }
  0x32   : > { %791 = sbr.rel (%p4536_p3) target bundleno = 3298 (0xce2), region = 120 }
  0x37   : > { %4339 = dma.done.wait (%p3915_p2), [#allocation3], 1024  }
  0x38   : > { %4341 = vsyncadd (%p3915_p2), [#allocation3], 4294966272 }
  0x39   : > { %4343 = dma.done.wait (%p3915_p2), [#allocation5], 2048  }
  0x3a   : > { %4345 = vsyncadd (%p3915_p2), [#allocation5], 4294965248 }
  0x3b   : > { %4347 = dma.done.wait (%p3915_p2), [#allocation8], 4096  }
  0x3c   : > { %4349 = vsyncadd (%p3915_p2), [#allocation8], 4294963200 }
  0x3d   : > { %4351 = dma.done.wait (%p3915_p2), [#allocation11], 3072  }
  0x3e   : > { %4353 = vsyncadd (%p3915_p2), [#allocation11], 4294964224 }
  0x3f   : > { %4355 = dma.done.wait (%p3915_p2), [#allocation14], 2048  }
  0x40   : > { %4357 = vsyncadd (%p3915_p2), [#allocation14], 4294965248  ;;  %p897_p6 = scmp.lt.s32.totalorder %s4528_s2, 1  ;;  %v4376_v0 = vmov 0   ;;  %s5166_s1 = sld [smem:[#allocation21_spill]] }
  0x41   : > { %3969 = vset.pattern.permute.xlu0 %v4376_v0  ;;  %s5167_s15 = sld [smem:[#allocation22_spill]]  ;;  %v4377_v16 = vmov 683565275   ;;  %v4378_v18 = vmov 2475754826   ;;  %s4383_s30 = smov 64  }
  0x42   : > { %s5176_s2 = smov (!%p897_p6, %s4528_s2), 1  ;;  %s5168_s6 = sld [smem:[#allocation23_spill]]  ;;  %v4379_v20 = vmov 2131351028   ;;  %v4380_v22 = vmov 2102212464  }
  0x43   : > { %s3310_s13 = sshll.u32 %s5176_s2, 3  ;;  %v4381_v27 = vmov 920167782   ;;  %v4382_v30 = vmov 1326507024   ;;  %s5169_s29 = sld [smem:[#allocation25_spill]] }
  0x44   : > { %s5172_s5 = sld [smem:[#allocation30_spill]]  ;;  %s4385_s3 = smov 112  }
  0x45   : > { %s4386_s28 = smov 96   ;;  %s4388_s26 = smov 80  }
  0x46   : > { %s900_s8 = scalar_lea.vmem %s5166_s1, %s3310_s13  ;;  %s5170_s13 = sld [smem:[#allocation27_spill]] }
  0x47   : > { %s903_s27 = scalar_lea.vmem %s5167_s15, %s5176_s2  ;;  %v4638_v1 = vld [vmem:[%s900_s8] sm:$0xff]  ;;  %s5171_s1 = sld [smem:[#allocation29_spill]] }
  0x48   : > { %913 = vperm.xlu0 %3969, %v4638_v1   ;;  %v4008_v2 = vld [vmem:[%s5168_s6] ss:$0 sm:$0xff]  ;;  %s4389_s9 = smov 32  }
  0xba   : > { %v914_v3 = vpop.permute.xlu0 %913 }
  0xbb   : > { %v4644_v4 = vmul.f32 %v4008_v2, %v914_v3 }
  0xbd   : > { %v923_v5 = vand.u32 2139095040, %v4644_v4  ;;  %v920_v7 = vand.u32 2147483647, %v4644_v4  ;;  %vm922_vm12 = vcmp.lt.s32.totalorder %v4644_v4, 0 }
  0xbf   : > { %v924_v6 = vshrl.u32 %v923_v5, 23  ;;  %v927_v10 = vand.u32 8388607, %v920_v7  ;;  %vm921_vm13 = vcmp.le.f32.partialorder %v920_v7, 0.7853982 }
  0xc1   : > { %v3313_v8 = vadd.s32 4294967169, %v924_v6  ;;  %v928_v13 = vor.u32 8388608, %v927_v10 }
  0xc3   : > { %v930_v9 = vadd.s32 1, %v3313_v8  ;;  %v4652_v32 = vshll.u32 %v928_v13, 8 }
  0xc5   : > { %vm931_vm0 = vcmp.gt.s32.totalorder %v930_v9, 0  ;;  %v969_v44 = vand.u32 65535, %v4652_v32  ;;  %v970_v46 = vshrl.u32 %v4652_v32, 16 }
  0xc6   : > { %v932_v11 = vsel %vm931_vm0, %v930_v9, 0 }
  0xc7   : > { %v934_v12 = vand.u32 31, %v932_v11  ;;  %v4650_v14 = vshrl.u32 %v932_v11, 5 }
  0xc9   : > { %v935_v15 = vsub.s32 32, %v934_v12  ;;  %v937_v17 = vshll.u32 %v4377_v16, %v934_v12  ;;  %v940_v19 = vshll.u32 %v4378_v18, %v934_v12  ;;  %v943_v21 = vshll.u32 %v4379_v20, %v934_v12 }
  0xca   : > { %v946_v23 = vshll.u32 %v4380_v22, %v934_v12  ;;  %v949_v29 = vshll.u32 %v4381_v27, %v934_v12  ;;  %vm952_vm1 = vcmp.lt.s32.totalorder %v4650_v14, 1  ;;  %vm955_vm2 = vcmp.lt.s32.totalorder %v4650_v14, 4 }
  0xcb   : > { %v938_v24 = vshrl.u32 %v4378_v18, %v935_v15  ;;  %v941_v25 = vshrl.u32 %v4379_v20, %v935_v15  ;;  %v944_v26 = vshrl.u32 %v4380_v22, %v935_v15  ;;  %v947_v28 = vshrl.u32 %v4381_v27, %v935_v15 }
  0xcc   : > { %v950_v31 = vshrl.u32 %v4382_v30, %v935_v15  ;;  %vm954_vm3 = vcmp.lt.s32.totalorder %v4650_v14, 3  ;;  %vm953_vm4 = vcmp.lt.s32.totalorder %v4650_v14, 2  ;;  %v936_v10 = vshrl.u32 %v4377_v16, %v935_v15 }
  0xcd   : > { %v939_v33 = vor.u32 %v938_v24, %v937_v17  ;;  %v942_v34 = vor.u32 %v941_v25, %v940_v19  ;;  %v945_v35 = vor.u32 %v944_v26, %v943_v21  ;;  %v948_v36 = vor.u32 %v947_v28, %v946_v23 }
  0xce   : > { %v951_v37 = vor.u32 %v950_v31, %v949_v29 }
  0xcf   : > { %v960_v38 = vsel %vm952_vm1, %v939_v33, %v942_v34  ;;  %v961_v39 = vsel %vm955_vm2, %v948_v36, 920167782  ;;  %v964_v40 = vsel %vm952_vm1, %v942_v34, %v945_v35  ;;  %v957_v6 = vsel %vm955_vm2, %v945_v35, 2102212464 }
  0xd0   : > { %v962_v41 = vsel %vm954_vm3, %v945_v35, %v961_v39  ;;  %v965_v42 = vsel %vm955_vm2, %v951_v37, 1326507024  ;;  %v956_v19 = vsel %vm952_vm1, %v936_v10, %v939_v33  ;;  %v958_v20 = vsel %vm954_vm3, %v942_v34, %v957_v6 }
  0xd1   : > { %v966_v43 = vsel %vm954_vm3, %v948_v36, %v965_v42  ;;  %v963_v45 = vsel %vm953_vm4, %v960_v38, %v962_v41  ;;  %v959_v16 = vsel %vm953_vm4, %v956_v19, %v958_v20  ;;  %v3763_v19 = vld [vmem:[#allocation2 + $0x8] sm:$0xff] }
  0xd2   : > { %v967_v47 = vsel %vm953_vm4, %v964_v40, %v966_v43  ;;  %v993_v48 = vand.u32 65535, %v963_v45  ;;  %v994_v49 = vshrl.u32 %v963_v45, 16  ;;  %v1013_v29 = vmul.u32 %v4652_v32, %v959_v16 }
  0xd3   : > { %v971_v50 = vand.u32 65535, %v967_v47  ;;  %v972_v51 = vshrl.u32 %v967_v47, 16  ;;  %vm1063_vm4 = vweird.f32 %v4644_v4 }
  0xd4   : > { %v996_v52 = vmul.u32 %v994_v49, %v969_v44  ;;  %v997_v53 = vmul.u32 %v993_v48, %v970_v46  ;;  %v995_v56 = vmul.u32 %v993_v48, %v969_v44  ;;  %v998_v60 = vmul.u32 %v994_v49, %v970_v46  ;;  %v3769_v48 = vld [vmem:[#allocation2 + $0x38] sm:$0xff] }
  0xd5   : > { %v974_v54 = vmul.u32 %v972_v51, %v969_v44  ;;  %v975_v55 = vmul.u32 %v971_v50, %v970_v46  ;;  %v973_v58 = vmul.u32 %v971_v50, %v969_v44  ;;  %v976_v61 = vmul.u32 %v972_v51, %v970_v46  ;;  %1304 = vmatpush.bf16.msra.mxu0 %v3769_v48  ;;  %v3768_v50 = vld [vmem:[#allocation2 + $0x30] sm:$0xff]  ;;  %v3779_v48 = vld [vmem:[#allocation6 + $0x8] sm:$0xff] }
  0xd6   : > { %v999_v57 = vshll.u32 %v996_v52, 16  ;;  %v1001_v62 = vshll.u32 %v997_v53, 16  ;;  %v1000_v17 = vshrl.u32 %v996_v52, 16  ;;  %v1002_v23 = vshrl.u32 %v997_v53, 16 }
  0xd7   : > { %v977_v59 = vshll.u32 %v974_v54, 16  ;;  %v979_v2 = vshll.u32 %v975_v55, 16  ;;  %v978_v21 = vshrl.u32 %v974_v54, 16  ;;  %v980_v25 = vshrl.u32 %v975_v55, 16  ;;  %v3767_v54 = vld [vmem:[#allocation2 + $0x28] sm:$0xff] }
  0xd8   : > { %vm1003_vm5 = vc.u32 %v995_v56, %v999_v57  ;;  %v1005_v63 = vadd.s32 %v999_v57, %v995_v56 }
  0xd9   : > { %vm981_vm6 = vc.u32 %v973_v58, %v977_v59  ;;  %v983_v3 = vadd.s32 %v977_v59, %v973_v58  ;;  %v1004_v5 = vsel %vm1003_vm5, 1, %v4376_v0  ;;  %1305 = vmatpush.bf16.msra.mxu0 %v3768_v50  ;;  %v3766_v59 = vld [vmem:[#allocation2 + $0x20] sm:$0xff]  ;;  %vm1233_vm5 = vcmask 523264  }
  0xda   : > { %v982_v8 = vsel %vm981_vm6, 1, %v4376_v0  ;;  %v1006_v9 = vadd.s32 %v1004_v5, %v998_v60  ;;  %vm1007_vm7 = vc.u32 %v1005_v63, %v1001_v62  ;;  %vm1579_vm6 = vcmask 1040384  }
  0xdb   : > { %v984_v11 = vadd.s32 %v982_v8, %v976_v61  ;;  %vm985_vm8 = vc.u32 %v983_v3, %v979_v2  ;;  %v1008_v12 = vsel %vm1007_vm7, 1, %v4376_v0  ;;  %v3765_v2 = vld [vmem:[#allocation2 + $0x18] sm:$0xff]  ;;  %vm1798_vm7 = vcmask 130048  }
  0xdc   : > { %v986_v13 = vsel %vm985_vm8, 1, %v4376_v0  ;;  %v1010_v18 = vadd.s32 %v1008_v12, %v1006_v9  ;;  %v1009_v0 = vadd.s32 %v1005_v63, %v1001_v62  ;;  %vm1834_vm8 = vcmask 72704  }
  0xdd   : > { %v988_v22 = vadd.s32 %v986_v13, %v984_v11  ;;  %1306 = vmatpush.bf16.msra.mxu0 %v3767_v54  ;;  %v3764_v11 = vld [vmem:[#allocation2 + $0x10] sm:$0xff]  ;;  %v3778_v54 = vld [vmem:[#allocation6] sm:$0xff] }
  0xde   : > { %v1011_v24 = vadd.s32 %v1010_v18, %v1000_v17 }
  0xdf   : > { %v989_v15 = vadd.s32 %v988_v22, %v978_v21 }
  0xe0   : > { %v1012_v26 = vadd.s32 %v1011_v24, %v1002_v23 }
  0xe1   : > { %v990_v27 = vadd.s32 %v989_v15, %v980_v25  ;;  %1307 = vmatpush.bf16.msra.mxu0 %v3766_v59  ;;  %v3790_v59 = vld [vmem:[#allocation7 + $0x20] sm:$0xff] }
  0xe2   : > { %v1016_v28 = vadd.s32 1, %v1012_v26 }
  0xe3   : > { %vm1015_vm9 = vc.u32 %v990_v27, %v1009_v0  ;;  %v1014_v41 = vadd.s32 %v1009_v0, %v990_v27 }
  0xe4   : > { %v1017_v30 = vsel %vm1015_vm9, %v1016_v28, %v1012_v26  ;;  %vm1838_vm9 = vcmask 65536  }
  0xe5   : > { %v1018_v31 = vadd.s32 %v1017_v30, %v1013_v29  ;;  %1308 = vmatpush.bf16.msra.mxu0 %v3765_v2 }
  0xe7   : > { %v1019_v33 = vadd.s32 536870912, %v1018_v31 }
  0xe9   : > { %v1020_v34 = vshrl.u32 %v1019_v33, 30  ;;  %1309 = vmatpush.bf16.msra.mxu0 %v3764_v11  ;;  %v3777_v33 = vld [vmem:[#allocation4 + $0x38] sm:$0xff] }
  0xea   : > { %1387 = vmatpush.bf16.msra.mxu1 %v3777_v33 }
  0xeb   : > { %v1021_v35 = vshll.u32 %v1020_v34, 30  ;;  %v1044_v56 = vsub.s32 4, %v1020_v34 }
  0xed   : > { %v1022_v36 = vsub.s32 %v1018_v31, %v1021_v35  ;;  %v1045_v61 = vsel %vm922_vm12, %v1044_v56, %v1020_v34  ;;  %1310 = vmatpush.bf16.msra.mxu0 %v3763_v19  ;;  %v3762_v31 = vld [vmem:[#allocation2] sm:$0xff]  ;;  %v3776_v34 = vld [vmem:[#allocation4 + $0x30] sm:$0xff]  ;;  %v3775_v35 = vld [vmem:[#allocation4 + $0x28] sm:$0xff]  ;;  %v4384_v56 = vmov 1  }
  0xee   : > { %v1047_v3 = vsel %vm921_vm13, 0, %v1045_v61  ;;  %1388 = vmatpush.bf16.msra.mxu1 %v3776_v34  ;;  %3970 = vset.pattern.permute.xlu1 %v4384_v56  ;;  %v3788_v61 = vld [vmem:[#allocation7 + $0x10] sm:$0xff] }
  0xef   : > { %vm1023_vm10 = vcmp.lt.s32.totalorder %v1022_v36, 0  ;;  %v1024_v37 = vsub.s32 0, %v1022_v36  ;;  %v1064_v10 = vadd.s32 3, %v1047_v3  ;;  %v1219_v22 = vand.u32 3, %v1047_v3  ;;  %4006 = vset.pattern.permute.xlu0 %v4384_v56  ;;  %1419 = vperm.xlu1 %3970, %v4638_v1   ;;  %v3521_v19 = vld [vmem:[#allocation9 + $0x90] sm:$0xf] }
  0xf0   : > { %v3481_v56 = vld [vmem:[#allocation9 + $0x38] sm:$0xf] }
  0xf1   : > { %v1025_v38 = vsel %vm1023_vm10, %v1024_v37, %v1022_v36  ;;  %v1065_v18 = vand.u32 3, %v1064_v10  ;;  %vm1220_vm0 = vcmp.lt.s32.totalorder %v1219_v22, 2  ;;  %vm1221_vm1 = vcmp.eq.s32.totalorder %v1219_v22, 0  ;;  %1311 = vmatpush.bf16.msra.mxu0 %v3762_v31  ;;  %v3773_v37 = vld [vmem:[#allocation4 + $0x18] sm:$0xff]  ;;  %v3815_v10 = vld [vmem:[#allocation9 + $0xac] sm:$0xf] }
  0xf2   : > { %v1026_v39 = vclz %v1025_v38  ;;  %vm1224_vm2 = vcmp.eq.s32.totalorder %v1219_v22, 2  ;;  %1389 = vmatpush.bf16.msra.mxu1 %v3775_v35  ;;  %v3497_v35 = vld [vmem:[#allocation9 + $0x60] sm:$0xf]  ;;  %vm2628_vm10 = vcmask 261120  }
  0xf3   : > { %vm1070_vm14 = vcmp.eq.s32.totalorder %v1065_v18, 2  ;;  %vm1067_vm15 = vcmp.eq.s32.totalorder %v1065_v18, 0  ;;  %vm1066_vm3 = vcmp.lt.s32.totalorder %v1065_v18, 2 }
  0xf4   : > { %v3314_v40 = vadd.s32 4294967294, %v1026_v39 }
  0xf6   : > { %vm3315_vm11 = vcmp.lt.s32.totalorder %v3314_v40, 0 }
  0xf7   : > { %v1029_v14 = vsel %vm3315_vm11, 0, %v3314_v40  ;;  %vm2631_vm11 = vcmask 392192  }
  0xf8   : > { %v1030_v42 = vsub.s32 32, %v1029_v14  ;;  %v1034_v43 = vsub.s32 4294967266, %v1029_v14  ;;  %v1031_v44 = vshll.u32 %v1022_v36, %v1029_v14  ;;  %v3774_v36 = vld [vmem:[#allocation4 + $0x20] sm:$0xff]  ;;  %v3771_v14 = vld [vmem:[#allocation4 + $0x8] sm:$0xff] }
  0xf9   : > { %1390 = vmatpush.bf16.msra.mxu1 %v3774_v36  ;;  %v3807_v36 = vld [vmem:[#allocation9 + $0x68] sm:$0xf0] }
  0xfa   : > { %v1032_v45 = vshrl.u32 %v1014_v41, %v1030_v42  ;;  %v1035_v32 = vadd.s32 127, %v1034_v43  ;;  %v3770_v41 = vld [vmem:[#allocation4] sm:$0xff]  ;;  %v3785_v42 = vld [vmem:[#allocation6 + $0x38] sm:$0xff]  ;;  %v3784_v43 = vld [vmem:[#allocation6 + $0x30] sm:$0xff] }
  0xfb   : > { %1474 = vmatpush.bf16.msra.mxu2 %v3785_v42  ;;  %v3485_v42 = vld [vmem:[#allocation9 + $0x48] sm:$0xf] }
  0xfc   : > { %v1033_v46 = vor.u32 %v1032_v45, %v1031_v44  ;;  %v1036_v47 = vshll.u32 %v1035_v32, 23  ;;  %v3783_v44 = vld [vmem:[#allocation6 + $0x28] sm:$0xff]  ;;  %v3782_v45 = vld [vmem:[#allocation6 + $0x20] sm:$0xff]  ;;  %v3781_v32 = vld [vmem:[#allocation6 + $0x18] sm:$0xff] }
  0xfd   : > { %1391 = vmatpush.bf16.msra.mxu1 %v3773_v37  ;;  %v3806_v37 = vld [vmem:[#allocation9 + $0x64] sm:$0xf] }
  0xfe   : > { %v1037_v49 = vor.u32 4788187, %v1036_v47  ;;  %v1040_v52 = vcvt.s32.f32 %v1033_v46  ;;  %v3780_v46 = vld [vmem:[#allocation6 + $0x10] sm:$0xff]  ;;  %v4009_v47 = vld [vmem:[%s5169_s29] ss:$0 sm:$0xff] }
  0xff   : > { %1475 = vmatpush.bf16.msra.mxu2 %v3784_v43  ;;  %v3804_v43 = vld [vmem:[#allocation9 + $0x50] sm:$0xf0] }
 0x100   : > { %v1038_v51 = vand.u32 2147483647, %v1037_v49 }
 0x102   : > { %v1041_v53 = vmul.f32 %v1040_v52, %v1038_v51 }
 0x103   : > { %1476 = vmatpush.bf16.msra.mxu2 %v3783_v44  ;;  %v3803_v44 = vld [vmem:[#allocation9 + $0x4c] sm:$0xf] }
 0x104   : > { %v1042_v55 = vxor.u32 2147483648, %v1041_v53 }
 0x106   : > { %v1043_v57 = vsel %vm922_vm12, %v1042_v55, %v1041_v53  ;;  %v3793_v55 = vld [vmem:[#allocation7 + $0x38] sm:$0xff]  ;;  %vm2636_vm12 = vcmask 654336  }
 0x107   : > { %v1046_v58 = vsel %vm921_vm13, %v4644_v4, %v1043_v57  ;;  %v3772_v4 = vld [vmem:[#allocation4 + $0x10] sm:$0xff]  ;;  %1477 = vmatpush.bf16.msra.mxu2 %v3782_v45  ;;  %1562 = vmatpush.bf16.msra.mxu3 %v3793_v55  ;;  %v3487_v45 = vld [vmem:[#allocation9 + $0x54] sm:$0xf0]  ;;  %v3475_v55 = vld [vmem:[#allocation9 + $0x3c] sm:$0xf0]  ;;  %vm2639_vm13 = vcmask 785408  }
 0x108   : > { %v1048_v60 = vmul.f32 %v1046_v58, %v1046_v58  ;;  %1392 = vmatpush.bf16.msra.mxu1 %v3772_v4  ;;  %v3792_v57 = vld [vmem:[#allocation7 + $0x30] sm:$0xff] }
 0x109   : > { %v3499_v4 = vld [vmem:[#allocation9 + $0x6c] sm:$0xf0] }
 0x10a   : > { %v1049_v62 = vmul.f32 -0.001358992, %v1048_v60  ;;  %v1056_v63 = vmul.f32 -0.00019511016, %v1048_v60 }
 0x10b   : > { %1478 = vmatpush.bf16.msra.mxu2 %v3781_v32  ;;  %1563 = vmatpush.bf16.msra.mxu3 %v3792_v57  ;;  %v3493_v32 = vld [vmem:[#allocation9 + $0x50] sm:$0xf]  ;;  %v3802_v57 = vld [vmem:[#allocation9 + $0x40] sm:$0xf0] }
 0x10c   : > { %v1050_v5 = vadd.f32 0.041655596, %v1049_v62  ;;  %v1057_v6 = vadd.f32 0.008332121, %v1056_v63  ;;  %1393 = vmatpush.bf16.msra.mxu1 %v3771_v14  ;;  %v4010_v62 = vld [vmem:[%s5170_s13] ss:$0 sm:$0xff]  ;;  %v3502_v14 = vor.u32 %v3806_v37, %v3499_v4 }
 0x10d   : > { %s4387_s13 = smov 48  }
 0x10e   : > { %v1051_v8 = vmul.f32 %v1050_v5, %v1048_v60  ;;  %v1058_v9 = vmul.f32 %v1057_v6, %v1048_v60  ;;  %v3787_v5 = vld [vmem:[#allocation7 + $0x8] sm:$0xff]  ;;  %v3786_v6 = vld [vmem:[#allocation7] sm:$0xff] }
 0x10f   : > { %1479 = vmatpush.bf16.msra.mxu2 %v3780_v46  ;;  %v3805_v46 = vld [vmem:[#allocation9 + $0x58] sm:$0xf0] }
 0x110   : > { %v1052_v7 = vadd.f32 -0.4999988, %v1051_v8  ;;  %v1059_v12 = vadd.f32 -0.16666654, %v1058_v9  ;;  %1394 = vmatpush.bf16.msra.mxu1 %v3770_v41  ;;  %v3533_v8 = vld [vmem:[#allocation9 + $0xa8] sm:$0xf] }
 0x111   : > { %v3816_v9 = vld [vmem:[#allocation9 + $0xb0] sm:$0xf0] }
 0x112   : > { %v1053_v13 = vmul.f32 %v1052_v7, %v1048_v60  ;;  %v1060_v17 = vmul.f32 %v1059_v12, %v1048_v60  ;;  %v3789_v60 = vld [vmem:[#allocation7 + $0x18] sm:$0xff]  ;;  %v3534_v11 = vor.u32 %v3816_v9, %v3533_v8  ;;  %v3541_v12 = vld [vmem:[#allocation9 + $0xb0] sm:$0xf]  ;;  %v3798_v9 = vld [vmem:[#allocation9 + $0x20] sm:$0xf0] }
 0x113   : > { %1480 = vmatpush.bf16.msra.mxu2 %v3779_v48  ;;  %v3535_v7 = vld [vmem:[#allocation9 + $0xb4] sm:$0xf0]  ;;  %v3486_v48 = vor.u32 %v3804_v43, %v3485_v42 }
 0x114   : > { %v1054_v20 = vadd.f32 1.0, %v1053_v13  ;;  %v1061_v21 = vadd.f32 1.0, %v1060_v17  ;;  %v3817_v13 = vld [vmem:[#allocation9 + $0xb8] sm:$0xf0]  ;;  %v3538_v17 = vor.u32 %v3815_v10, %v3535_v7  ;;  %1750 = vmatpush.bf16.msrb.mxu0 %v3534_v11  ;;  %v3461_v8 = vld [vmem:[#allocation9 + $0x18] sm:$0xf] }
 0x115   : > { %v3542_v18 = vor.u32 %v3817_v13, %v3541_v12  ;;  %v3797_v10 = vld [vmem:[#allocation9 + $0x1c] sm:$0xf]  ;;  %v3462_v11 = vor.u32 %v3798_v9, %v3461_v8  ;;  %v3463_v7 = vld [vmem:[#allocation9 + $0x24] sm:$0xf0]  ;;  %v3469_v12 = vld [vmem:[#allocation9 + $0x20] sm:$0xf] }
 0x116   : > { %v1062_v23 = vmul.f32 %v1061_v21, %v1046_v58  ;;  %v1071_v24 = vxor.u32 2147483648, %v1054_v20  ;;  %v3791_v58 = vld [vmem:[#allocation7 + $0x28] sm:$0xff]  ;;  %v3812_v21 = vld [vmem:[#allocation9 + $0x94] sm:$0xf]  ;;  %1764 = vmatpush.bf16.msrb.mxu1 %v3538_v17  ;;  %v3466_v17 = vor.u32 %v3797_v10, %v3463_v7 }
 0x117   : > { %1481 = vmatpush.bf16.msra.mxu2 %v3778_v54  ;;  %1564 = vmatpush.bf16.msra.mxu3 %v3791_v58  ;;  %v3799_v13 = vld [vmem:[#allocation9 + $0x28] sm:$0xf0] }
 0x118   : > { %v1068_v25 = vxor.u32 2147483648, %v1062_v23  ;;  %v1072_v15 = vsel %vm1070_vm14, %v1071_v24, %v1062_v23  ;;  %v1226_v26 = vsel %vm1224_vm2, %v1071_v24, %v1062_v23  ;;  %v3523_v23 = vld [vmem:[#allocation9 + $0x9c] sm:$0xf0]  ;;  %v3529_v24 = vld [vmem:[#allocation9 + $0x98] sm:$0xf]  ;;  %vm2642_vm14 = vcmask 916480  }
 0x11a   : > { %v1223_v16 = vsel %vm1221_vm1, %v1054_v20, %v1068_v25  ;;  %v1069_v27 = vsel %vm1067_vm15, %v1054_v20, %v1068_v25  ;;  %v3813_v20 = vld [vmem:[#allocation9 + $0x98] sm:$0xf0]  ;;  %v3814_v25 = vld [vmem:[#allocation9 + $0xa0] sm:$0xf0] }
 0x11b   : > { %v1227_v0 = vsel %vm1220_vm0, %v1223_v16, %v1226_v26  ;;  %v1073_v28 = vsel %vm1066_vm3, %v1069_v27, %v1072_v15  ;;  %1565 = vmatpush.bf16.msra.mxu3 %v3790_v59  ;;  %v3522_v22 = vor.u32 %v3813_v20, %v3521_v19  ;;  %1778 = vmatpush.bf16.msrb.mxu2 %v3542_v18  ;;  %v3509_v26 = vld [vmem:[#allocation9 + $0x78] sm:$0xf]  ;;  %v3810_v27 = vld [vmem:[#allocation9 + $0x80] sm:$0xf0]  ;;  %v3449_v19 = vld [vmem:[#allocation9] sm:$0xf] }
 0x11c   : > { %v1228_v29 = vsel %vm1063_vm4, nan, %v1227_v0  ;;  %v1074_v30 = vsel %vm1063_vm4, nan, %v1073_v28  ;;  %v3526_v15 = vor.u32 %v3812_v21, %v3523_v23  ;;  %v3530_v16 = vor.u32 %v3814_v25, %v3529_v24  ;;  %v3809_v0 = vld [vmem:[#allocation9 + $0x7c] sm:$0xf]  ;;  %v3511_v28 = vld [vmem:[#allocation9 + $0x84] sm:$0xf0] }
 0x11d   : > { %1230 = vrot.lane.b32.xlu0 %v1228_v29, %s4383_s30  ;;  %v3517_v29 = vld [vmem:[#allocation9 + $0x80] sm:$0xf]  ;;  %1751 = vmatpush.bf16.msrb.mxu0 %v3522_v22  ;;  %v3510_v31 = vor.u32 %v3810_v27, %v3509_v26  ;;  %v3514_v33 = vor.u32 %v3809_v0, %v3511_v28  ;;  %v3470_v18 = vor.u32 %v3799_v13, %v3469_v12  ;;  %v3795_v20 = vld [vmem:[#allocation9 + $0x8] sm:$0xf0]  ;;  %v3794_v21 = vld [vmem:[#allocation9 + $0x4] sm:$0xf] }
 0x11e   : > { %1765 = vmatpush.bf16.msrb.mxu1 %v3526_v15  ;;  %v3450_v22 = vor.u32 %v3795_v20, %v3449_v19  ;;  %v3451_v23 = vld [vmem:[#allocation9 + $0xc] sm:$0xf0]  ;;  %v3457_v24 = vld [vmem:[#allocation9 + $0x8] sm:$0xf]  ;;  %v3796_v25 = vld [vmem:[#allocation9 + $0x10] sm:$0xf0] }
 0x11f   : > { %1566 = vmatpush.bf16.msra.mxu3 %v3789_v60  ;;  %1779 = vmatpush.bf16.msrb.mxu2 %v3530_v16  ;;  %v3454_v15 = vor.u32 %v3794_v21, %v3451_v23  ;;  %v3458_v16 = vor.u32 %v3796_v25, %v3457_v24  ;;  %v4013_v26 = vld [vmem:[%s5126_s11] ss:$0 sm:$0xff] }
 0x120   : > { %v1575_v28 = vld [vmem:[%s5127_s12] sm:$0x1] }
 0x121   : > { %1752 = vmatpush.bf16.msrb.mxu0 %v3510_v31 }
 0x122   : > { %1766 = vmatpush.bf16.msrb.mxu1 %v3514_v33 }
 0x123   : > { %1567 = vmatpush.bf16.msra.mxu3 %v3788_v61  ;;  %v3482_v61 = vor.u32 %v3802_v57, %v3481_v56 }
 0x126   : > { %1767 = vmatpush.bf16.msrb.mxu1 %v3502_v14 }
 0x127   : > { %1568 = vmatpush.bf16.msra.mxu3 %v3787_v5 }
 0x12b   : > { %1569 = vmatpush.bf16.msra.mxu3 %v3786_v6 }
 0x161   : > { %v1420_v54 = vpop.permute.xlu1 %1419 }
 0x18f   : > { %v1231_v38 = vpop.permute.xlu0 %1230 }
 0x190   : > { %v1234_v39 = vsel %vm1233_vm5, %v1074_v30, %v1231_v38  ;;  %v3811_v30 = vld [vmem:[#allocation9 + $0x88] sm:$0xf0]  ;;  %v3505_v38 = vld [vmem:[#allocation9 + $0x68] sm:$0xf] }
 0x191   : > { %v1235_v40 = vpack.c.bf16 %v1234_v39, %v1234_v39  ;;  %v3518_v34 = vor.u32 %v3811_v30, %v3517_v29  ;;  %v3808_v39 = vld [vmem:[#allocation9 + $0x70] sm:$0xf0] }
 0x192   : > { %v3506_v41 = vor.u32 %v3808_v39, %v3505_v38 }
 0x193   : > { %1312 = vmatmul.bf16.vlgmr.msra.gmra.mxu0 %v1235_v40  ;;  %v3498_v40 = vor.u32 %v3807_v36, %v3497_v35  ;;  %1780 = vmatpush.bf16.msrb.mxu2 %v3518_v34  ;;  %v1614_v34 = vld [vmem:[%s5129_s14] sm:$0x7] }
 0x194   : > { %v1616_v35 = vperm.slane %v1614_v34, 0  ;;  %v1617_v36 = vperm.slane %v1614_v34, 1 }
 0x195   : > { %1753 = vmatpush.bf16.msrb.mxu0 %v3498_v40 }
 0x197   : > { %1781 = vmatpush.bf16.msrb.mxu2 %v3506_v41 }
 0x199   : > { %1754 = vmatpush.bf16.msrb.mxu0 %v3486_v48 }
 0x210   : > { %v1313_v49 = vpop.f32.mrf.mxu0 }
 0x211   : > { %v1314_v50 = vadd.f32 %v4009_v47, %v1313_v49  ;;  %v4011_v47 = vld [vmem:[%s5171_s1] ss:$0 sm:$0xff]  ;;  %v3490_v49 = vor.u32 %v3803_v44, %v3487_v45 }
 0x212   : > { %v1425_v59 = vmul.f32 %v4011_v47, %v1420_v54 }
 0x213   : > { %v1317_v51 = vmax.f32 %v1314_v50, 0.0  ;;  %v3494_v50 = vor.u32 %v3805_v46, %v3493_v32  ;;  %1768 = vmatpush.bf16.msrb.mxu1 %v3490_v49  ;;  %v1618_v32 = vperm.slane %v1614_v34, 2 }
 0x215   : > { %v1318_v52 = vpack.c.bf16 %v1317_v51, %v1317_v51  ;;  %v3473_v51 = vld [vmem:[#allocation9 + $0x30] sm:$0xf]  ;;  %1782 = vmatpush.bf16.msrb.mxu2 %v3494_v50 }
 0x217   : > { %1395 = vmatmul.bf16.vlgmr.msra.gmra.mxu1 %v1318_v52  ;;  %v3801_v52 = vld [vmem:[#allocation9 + $0x38] sm:$0xf0] }
 0x218   : > { %v1315_v53 = vpop.f32.mrf.mxu0  ;;  %v3474_v58 = vor.u32 %v3801_v52, %v3473_v51 }
 0x219   : > { %v3800_v53 = vld [vmem:[#allocation9 + $0x34] sm:$0xf]  ;;  %1783 = vmatpush.bf16.msrb.mxu2 %v3482_v61 }
 0x21a   : > { %v3478_v60 = vor.u32 %v3800_v53, %v3475_v55  ;;  %1755 = vmatpush.bf16.msrb.mxu0 %v3474_v58 }
 0x21c   : > { %1769 = vmatpush.bf16.msrb.mxu1 %v3478_v60 }
 0x21d   : > { %1784 = vmatpush.bf16.msrb.mxu2 %v3470_v18 }
 0x21e   : > { %1756 = vmatpush.bf16.msrb.mxu0 %v3462_v11 }
 0x220   : > { %1770 = vmatpush.bf16.msrb.mxu1 %v3466_v17 }
 0x221   : > { %1785 = vmatpush.bf16.msrb.mxu2 %v3458_v16 }
 0x222   : > { %1757 = vmatpush.bf16.msrb.mxu0 %v3450_v22 }
 0x224   : > { %1771 = vmatpush.bf16.msrb.mxu1 %v3454_v15 }
 0x294   : > { %v1396_v63 = vpop.f32.mrf.mxu1 }
 0x295   : > { %v1397_v2 = vadd.f32 %v4010_v62, %v1396_v63  ;;  %v4012_v62 = vld [vmem:[%s5172_s5] ss:$0 sm:$0xff] }
 0x297   : > { %v1400_v3 = vpack.c.bf16 %v1397_v2, %v1397_v2 }
 0x299   : > { %1482 = vmatmul.bf16.vlgmr.msra.gmra.mxu2 %v1400_v3 }
 0x29c   : > { %v1398_v1 = vpop.f32.mrf.mxu1 }
 0x31c   : > { %v1483_v63 = vpop.f32.mrf.mxu2 }
 0x31d   : > { %v1484_v2 = vadd.f32 %v1483_v63, %v1425_v59  ;;  %v4787_v59 = vld [vmem:[%s903_s27] ss:$0 sm:$0xff]  ;;  %s4390_s27 = smov 16  }
 0x31f   : > { %v1491_v3 = vadd.f32 %v4012_v62, %v1484_v2 }
 0x321   : > { %v1492_v1 = vmax.f32 %v1491_v3, 0.0 }
 0x323   : > { %v1493_v5 = vpack.c.bf16 %v1492_v1, %v1492_v1 }
 0x324   : > { %v1485_v6 = vpop.f32.mrf.mxu2 }
 0x325   : > { %1570 = vmatmul.bf16.vlgmr.msra.gmra.mxu3 %v1493_v5 }
 0x3a8   : > { %v1571_v27 = vpop.f32.mrf.mxu3 }
 0x3a9   : > { %v1572_v0 = vadd.f32 %v4013_v26, %v1571_v27 }
 0x3ab   : > { %v4715_v29 = vrot.slane %v1572_v0, 7 }
 0x3ad   : > { %v4719_v30 = vsel %vm1579_vm6, %v1575_v28, %v4715_v29 }
 0x3ae   : > { %v1581_v31 = vpack.c.bf16 %v4715_v29, %v4719_v30 }
 0x3b0   : > { %v1573_v33 = vpop.f32.mrf.mxu3  ;;  %1758 = vmatmul.bf16.vlgmr.msrb.gmra.mxu0 %v1581_v31  ;;  %1772 = vmatmul.bf16.vlgmr.msrb.gmra.mxu1 %v1581_v31 }
 0x3b1   : > { %1786 = vmatmul.bf16.vlgmr.msrb.gmra.mxu2 %v1581_v31 }
 0x42d   : > { %v1759_v37 = vpop.f32.mrf.mxu0  ;;  %v1773_v4 = vpop.f32.mrf.mxu1 }
 0x42e   : > { %v1760_v38 = vadd.f32 %v1759_v37, %v1616_v35  ;;  %v4726_v39 = vadd.f32 %v1773_v4, %v1617_v36 }
 0x430   : > { %v4728_v40 = vmul.f32 0.25, %v1760_v38  ;;  %1894 = vrot.lane.b32.xlu2 %v4726_v39, %s4385_s3 }
 0x432   : > { %1988 = vrot.lane.b32.xlu0 %v4728_v40, %s4386_s28  ;;  %1890 = vrot.lane.b32.xlu1 %v4728_v40, %s4385_s3 }
 0x434   : > { %v1787_v14 = vpop.f32.mrf.mxu2 }
 0x435   : > { %v1761_v41 = vpop.f32.mrf.mxu0  ;;  %v1775_v42 = vpop.f32.mrf.mxu1  ;;  %v4748_v48 = vadd.f32 %v1787_v14, %v1618_v32 }
 0x436   : > { %v1762_v43 = vadd.f32 %v1761_v41, %v1616_v35  ;;  %v1776_v44 = vadd.f32 %v1775_v42, %v1617_v36 }
 0x438   : > { %v4736_v45 = vmul.f32 0.25, %v1762_v43  ;;  %3543 = vmatpush.xpose.msk.msrb.mxu3 %vm1798_vm7, %v1776_v44  ;;  %1992 = vrot.lane.b32.xlu2 %v4726_v39, %s4386_s28 }
 0x43a   : > { %2188 = vrot.lane.b32.xlu0 %v1776_v44, %s4383_s30  ;;  %1990 = vrot.lane.b32.xlu1 %v4736_v45, %s4386_s28 }
 0x43c   : > { %v1789_v46 = vpop.f32.mrf.mxu2  ;;  %3544 = vmatpush.xpose.msk.msrb.mxu3 %vm1798_vm7, %v4726_v39 }
 0x43d   : > { %v4746_v47 = vadd.f32 %v1789_v46, %v1618_v32 }
 0x43f   : > { %3545 = vmatmul.msk.f32.vlgmr.msrb.gmra.mxu3 %vm1798_vm7, %v4728_v40 }
 0x440   : > { %3547 = vmatpush.msk.msra.mxu3 %vm1579_vm6, %v4746_v47  ;;  %1896 = vrot.lane.b32.xlu2 %v1776_v44, %s4385_s3 }
 0x442   : > { %1882 = vmatpush.msra.mxu3 %v4748_v48  ;;  %2186 = vrot.lane.b32.xlu0 %v4726_v39, %s4383_s30 }
 0x447   : > { %3546 = vmatmul.msk.f32.gmra.mxu3 %vm1798_vm7, %v4736_v45 }
 0x448   : > { %1994 = vrot.lane.b32.xlu2 %v1776_v44, %s4386_s28 }
 0x44a   : > { %2285 = vrot.lane.b32.xlu0 %v1776_v44, %s4387_s13 }
 0x450   : > { %2091 = vrot.lane.b32.xlu2 %v1776_v44, %s4388_s26 }
 0x452   : > { %2283 = vrot.lane.b32.xlu0 %v4726_v39, %s4387_s13 }
 0x458   : > { %1892 = vrot.lane.b32.xlu2 %v4736_v45, %s4385_s3 }
 0x45a   : > { %2376 = vrot.lane.b32.xlu0 %v4728_v40, %s4389_s9 }
 0x462   : > { %2378 = vrot.lane.b32.xlu0 %v4736_v45, %s4389_s9 }
 0x48a   : > { %v1895_v49 = vpop.permute.xlu2 %1894 }
 0x492   : > { %v1993_v50 = vpop.permute.xlu2 %1992 }
 0x49a   : > { %v1897_v51 = vpop.permute.xlu2 %1896 }
 0x49b   : > { %3550 = vmatpush.xpose.msk.msra.mxu0 %vm1798_vm7, %v1897_v51 }
 0x49f   : > { %3551 = vmatpush.xpose.msk.msra.mxu0 %vm1798_vm7, %v1895_v49 }
 0x4a2   : > { %v1995_v52 = vpop.permute.xlu2 %1994 }
 0x4a3   : > { %3557 = vmatpush.xpose.msk.msrb.mxu3 %vm1798_vm7, %v1995_v52 }
 0x4a4   : > { %v4774_v53 = vpop.permute.xlu0 %1988  ;;  %v1891_v54 = vpop.permute.xlu1 %1890 }
 0x4a5   : > { %3552 = vmatmul.msk.f32.vlgmr.msra.gmra.mxu0 %vm1798_vm7, %v1891_v54 }
 0x4a7   : > { %3558 = vmatpush.xpose.msk.msrb.mxu3 %vm1798_vm7, %v1993_v50 }
 0x4aa   : > { %v2092_v55 = vpop.permute.xlu2 %2091 }
 0x4ab   : > { %3564 = vmatpush.xpose.msk.msrb.mxu0 %vm1798_vm7, %v2092_v55 }
 0x4ac   : > { %v2189_v56 = vpop.permute.xlu0 %2188  ;;  %v4808_v8 = vpop.permute.xlu1 %1990 }
 0x4ad   : > { %3571 = vmatpush.xpose.msk.msra.mxu2 %vm1798_vm7, %v2189_v56 }
 0x4b2   : > { %v1893_v57 = vpop.permute.xlu2 %1892 }
 0x4b3   : > { %3553 = vmatmul.msk.f32.gmra.mxu0 %vm1798_vm7, %v1893_v57 }
 0x4b4   : > { %v2187_v58 = vpop.permute.xlu0 %2186 }
 0x4b5   : > { %3572 = vmatpush.xpose.msk.msra.mxu2 %vm1798_vm7, %v2187_v58 }
 0x4bc   : > { %v2286_v18 = vpop.permute.xlu0 %2285 }
 0x4c2   : > { %v1828_v60 = vpop.f32.mrf.mxu3 }
 0x4c3   : > { %v1829_v61 = vadd.f32 %v4787_v59, %v1828_v60 }
 0x4c4   : > { %v2284_v24 = vpop.permute.xlu0 %2283 }
 0x4c5   : > { %v1835_v62 = vsel %vm1834_vm8, %v1829_v61, -inf }
 0x4c6   : > { %1836 = vmax.xlane.f32.xlu1 %v1835_v62 }
 0x4ca   : > { %v1831_v63 = vpop.f32.mrf.mxu3 }
 0x4cb   : > { %v1832_v2 = vadd.f32 %v4787_v59, %v1831_v63 }
 0x4cc   : > { %v2377_v31 = vpop.permute.xlu0 %2376 }
 0x4cd   : > { %v1839_v3 = vsel %vm1838_vm9, %v1832_v2, -inf }
 0x4ce   : > { %1840 = vmax.xlane.f32.xlu2 %v1839_v3 }
 0x4d4   : > { %v2379_v33 = vpop.permute.xlu0 %2378 }
 0x4df   : > { %2085 = vrot.lane.b32.xlu1 %v4728_v40, %s4388_s26 }
 0x4e6   : > { %2089 = vrot.lane.b32.xlu2 %v4726_v39, %s4388_s26 }
 0x4e7   : > { %2087 = vrot.lane.b32.xlu1 %v4736_v45, %s4388_s26 }
 0x4ef   : > { %2382 = vrot.lane.b32.xlu1 %v1776_v44, %s4389_s9 }
 0x4f7   : > { %2380 = vrot.lane.b32.xlu1 %v4726_v39, %s4389_s9 }
 0x4ff   : > { %2479 = vrot.lane.b32.xlu1 %v1776_v44, %s4390_s27 }
 0x507   : > { %2473 = vrot.lane.b32.xlu1 %v4728_v40, %s4390_s27 }
 0x522   : > { %v1923_v1 = vpop.f32.mrf.mxu0 }
 0x523   : > { %v4835_v0 = vadd.f32 %v4787_v59, %v1923_v1 }
 0x525   : > { %v1929_v28 = vsel %vm1834_vm8, %v4835_v0, -inf }
 0x530   : > { %v1926_v5 = vpop.f32.mrf.mxu0 }
 0x531   : > { %v4806_v6 = vadd.f32 %v4787_v59, %v1926_v5 }
 0x533   : > { %v1932_v9 = vsel %vm1838_vm9, %v4806_v6, -inf }
 0x534   : > { %1933 = vmax.xlane.f32.xlu1 %v1932_v9 }
 0x539   : > { %v1837_v10 = vpop.xlane.xlu1 %1836 }
 0x53a   : > { %v1842_v11 = vsub.f32 %v1829_v61, %v1837_v10 }
 0x53c   : > { %v1844_v7 = vmul.f32 1.442695, %v1842_v11 }
 0x53e   : > { %4020 = vpow2.f32 %v1844_v7 }
 0x541   : > { %v1841_v12 = vpop.xlane.xlu2 %1840 }
 0x542   : > { %v1843_v13 = vsub.f32 %v1832_v2, %v1841_v12 }
 0x544   : > { %v4021_v17 = vpop.eup %4020  ;;  %v1846_v19 = vmul.f32 1.442695, %v1843_v13 }
 0x545   : > { %v1848_v20 = vsel %vm1834_vm8, %v4021_v17, 0.0 }
 0x546   : > { %4022 = vpow2.f32 %v1846_v19  ;;  %1849 = vadd.xlane.f32.xlu2 %v1848_v20 }
 0x549   : > { %v2090_v21 = vpop.permute.xlu2 %2089 }
 0x54a   : > { %3565 = vmatpush.xpose.msk.msrb.mxu0 %vm1798_vm7, %v2090_v21 }
 0x54c   : > { %v4023_v22 = vpop.eup %4022 }
 0x54d   : > { %v1851_v23 = vsel %vm1838_vm9, %v4023_v22, 0.0 }
 0x54e   : > { %3578 = vmatpush.xpose.msk.msra.mxu0 %vm1798_vm7, %v2286_v18  ;;  %1852 = vadd.xlane.f32.xlu0 %v1851_v23 }
 0x551   : > { %v2086_v25 = vpop.permute.xlu1 %2085 }
 0x552   : > { %3579 = vmatpush.xpose.msk.msra.mxu0 %vm1798_vm7, %v2284_v24 }
 0x553   : > { %3566 = vmatmul.msk.f32.vlgmr.msrb.gmra.mxu0 %vm1798_vm7, %v2086_v25 }
 0x559   : > { %v2088_v15 = vpop.permute.xlu1 %2087 }
 0x55b   : > { %3567 = vmatmul.msk.f32.gmra.mxu0 %vm1798_vm7, %v2088_v15 }
 0x55e   : > { %2182 = vrot.lane.b32.xlu2 %v4728_v40, %s4383_s30 }
 0x561   : > { %v2383_v16 = vpop.permute.xlu1 %2382 }
 0x562   : > { %2475 = vrot.lane.b32.xlu0 %v4736_v45, %s4390_s27  ;;  %3585 = vmatpush.xpose.msk.msrb.mxu2 %vm1798_vm7, %v2383_v16 }
 0x566   : > { %2184 = vrot.lane.b32.xlu2 %v4736_v45, %s4383_s30 }
 0x569   : > { %v2381_v26 = vpop.permute.xlu1 %2380 }
 0x56a   : > { %3586 = vmatpush.xpose.msk.msrb.mxu2 %vm1798_vm7, %v2381_v26 }
 0x56e   : > { %2279 = vrot.lane.b32.xlu2 %v4728_v40, %s4387_s13 }
 0x571   : > { %v2480_v27 = vpop.permute.xlu1 %2479 }
 0x572   : > { %3592 = vmatpush.xpose.msk.msrb.mxu0 %vm1798_vm7, %v2480_v27 }
 0x576   : > { %2281 = vrot.lane.b32.xlu2 %v4736_v45, %s4387_s13 }
 0x579   : > { %v2474_v50 = vpop.permute.xlu1 %2473 }
 0x57e   : > { %2477 = vrot.lane.b32.xlu2 %v4726_v39, %s4390_s27 }
 0x5a7   : > { %1930 = vmax.xlane.f32.xlu2 %v1929_v28  ;;  %v1934_v15 = vpop.xlane.xlu1 %1933 }
 0x5a8   : > { %v1936_v26 = vsub.f32 %v4806_v6, %v1934_v15 }
 0x5aa   : > { %v1939_v28 = vmul.f32 1.442695, %v1936_v26 }
 0x5b9   : > { %v1850_v34 = vpop.xlane.xlu2 %1849 }
 0x5ba   : > { %4024 = vrcp.f32 %v1850_v34 }
 0x5c0   : > { %v4025_v35 = vpop.eup %4024 }
 0x5c1   : > { %v1856_v36 = vmul.f32 %v4025_v35, %v4021_v17  ;;  %v1853_v37 = vpop.xlane.xlu0 %1852  ;;  %v2183_v4 = vpop.permute.xlu2 %2182 }
 0x5c2   : > { %4026 = vrcp.f32 %v1853_v37  ;;  %3573 = vmatmul.msk.f32.vlgmr.msra.gmra.mxu2 %vm1798_vm7, %v2183_v4 }
 0x5c3   : > { %3548 = vmatmul.msk.f32.vlgmr.msra.gmra.mxu3 %vm1834_vm8, %v1856_v36 }
 0x5c8   : > { %v4027_v38 = vpop.eup %4026 }
 0x5c9   : > { %v2185_v39 = vpop.permute.xlu2 %2184  ;;  %v1857_v40 = vmul.f32 %v4027_v38, %v4023_v22 }
 0x5ca   : > { %3574 = vmatmul.msk.f32.gmra.mxu2 %vm1798_vm7, %v2185_v39 }
 0x5cb   : > { %3549 = vmatmul.msk.f32.gmra.mxu3 %vm1834_vm8, %v1857_v40 }
 0x5d0   : > { %v2118_v14 = vpop.f32.mrf.mxu0 }
 0x5d1   : > { %v2119_v41 = vadd.f32 %v4787_v59, %v2118_v14  ;;  %v2280_v42 = vpop.permute.xlu2 %2279 }
 0x5d2   : > { %3580 = vmatmul.msk.f32.vlgmr.msra.gmra.mxu0 %vm1798_vm7, %v2280_v42  ;;  %3587 = vmatmul.msk.f32.vlgmr.msrb.gmra.mxu2 %vm1798_vm7, %v2377_v31 }
 0x5d3   : > { %v2124_v43 = vsel %vm1834_vm8, %v2119_v41, -inf  ;;  %3559 = vmatmul.msk.f32.vlgmr.msrb.gmra.mxu3 %vm1798_vm7, %v4774_v53 }
 0x5d4   : > { %2125 = vmax.xlane.f32.xlu2 %v2124_v43  ;;  %v2476_v51 = vpop.permute.xlu0 %2475 }
 0x5d8   : > { %v2121_v44 = vpop.f32.mrf.mxu0 }
 0x5d9   : > { %v4850_v45 = vadd.f32 %v4787_v59, %v2121_v44  ;;  %v2282_v32 = vpop.permute.xlu2 %2281 }
 0x5da   : > { %3581 = vmatmul.msk.f32.gmra.mxu0 %vm1798_vm7, %v2282_v32  ;;  %3588 = vmatmul.msk.f32.gmra.mxu2 %vm1798_vm7, %v2379_v33 }
 0x5db   : > { %v2127_v46 = vsel %vm1838_vm9, %v4850_v45, -inf  ;;  %3560 = vmatmul.msk.f32.gmra.mxu3 %vm1798_vm7, %v4808_v8 }
 0x5dc   : > { %2128 = vmax.xlane.f32.xlu0 %v2127_v46 }
 0x5e1   : > { %v2478_v49 = vpop.permute.xlu2 %2477 }
 0x5e2   : > { %3593 = vmatpush.xpose.msk.msrb.mxu0 %vm1798_vm7, %v2478_v49 }
 0x5e5   : > { %3594 = vmatmul.msk.f32.vlgmr.msrb.gmra.mxu0 %vm1798_vm7, %v2474_v50 }
 0x5ed   : > { %3595 = vmatmul.msk.f32.gmra.mxu0 %vm1798_vm7, %v2476_v51 }
 0x61a   : > { %v1931_v63 = vpop.xlane.xlu2 %1930 }
 0x61b   : > { %v1935_v23 = vsub.f32 %v4835_v0, %v1931_v63 }
 0x61d   : > { %v1937_v24 = vmul.f32 1.442695, %v1935_v23 }
 0x645   : > { %v2215_v52 = vpop.f32.mrf.mxu2 }
 0x646   : > { %v4862_v53 = vadd.f32 %v4787_v59, %v2215_v52  ;;  %v4917_v25 = vpop.f32.mrf.mxu3 }
 0x647   : > { %v2126_v1 = vpop.xlane.xlu2 %2125 }
 0x648   : > { %v2221_v54 = vsel %vm1834_vm8, %v4862_v53, -inf  ;;  %v2130_v9 = vsub.f32 %v2119_v41, %v2126_v1 }
 0x649   : > { %2222 = vmax.xlane.f32.xlu2 %v2221_v54 }
 0x64a   : > { %v2132_v7 = vmul.f32 1.442695, %v2130_v9 }
 0x64c   : > { %4028 = vpow2.f32 %v2132_v7 }
 0x64d   : > { %v2218_v55 = vpop.f32.mrf.mxu2  ;;  %4030 = vpow2.f32 %v1937_v24 }
 0x64e   : > { %v4867_v56 = vadd.f32 %v4787_v59, %v2218_v55  ;;  %v4927_v34 = vpop.f32.mrf.mxu3  ;;  %4032 = vpow2.f32 %v1939_v28 }
 0x64f   : > { %v2312_v62 = vpop.f32.mrf.mxu0  ;;  %v2129_v31 = vpop.xlane.xlu0 %2128 }
 0x650   : > { %v2224_v57 = vsel %vm1838_vm9, %v4867_v56, -inf  ;;  %v4920_v16 = vadd.f32 %v4787_v59, %v2312_v62  ;;  %v2131_v0 = vsub.f32 %v4850_v45, %v2129_v31 }
 0x651   : > { %2225 = vmax.xlane.f32.xlu0 %v2224_v57 }
 0x652   : > { %v4910_v20 = vpop.eup %4028  ;;  %v2318_v27 = vsel %vm1834_vm8, %v4920_v16, -inf  ;;  %v2134_v37 = vmul.f32 1.442695, %v2131_v0 }
 0x653   : > { %v2136_v22 = vsel %vm1834_vm8, %v4910_v20, 0.0  ;;  %v4925_v33 = vpop.eup %4030 }
 0x654   : > { %v1941_v35 = vsel %vm1834_vm8, %v4925_v33, 0.0  ;;  %v4933_v38 = vpop.eup %4032 }
 0x655   : > { %v2409_v58 = vpop.f32.mrf.mxu2  ;;  %v1944_v40 = vsel %vm1838_vm9, %v4933_v38, 0.0 }
 0x656   : > { %v4872_v60 = vadd.f32 %v4787_v59, %v2409_v58  ;;  %v2021_v39 = vpop.f32.mrf.mxu3 }
 0x657   : > { %v2315_v2 = vpop.f32.mrf.mxu0  ;;  %v4957_v54 = vadd.f32 %v4787_v59, %v2021_v39 }
 0x658   : > { %v2415_v61 = vsel %vm1834_vm8, %v4872_v60, -inf  ;;  %v4901_v12 = vadd.f32 %v4787_v59, %v2315_v2 }
 0x659   : > { %2416 = vmax.xlane.f32.xlu1 %v2415_v61 }
 0x65a   : > { %v2321_v18 = vsel %vm1838_vm9, %v4901_v12, -inf }
 0x65d   : > { %v2412_v3 = vpop.f32.mrf.mxu2 }
 0x65e   : > { %v4893_v5 = vadd.f32 %v4787_v59, %v2412_v3  ;;  %v2024_v49 = vpop.f32.mrf.mxu3 }
 0x65f   : > { %v4950_v51 = vadd.f32 %v4787_v59, %v2024_v49 }
 0x660   : > { %v2418_v10 = vsel %vm1838_vm9, %v4893_v5, -inf }
 0x661   : > { %1954 = vrot.lane.b32.xlu2 %v4746_v47, %s4385_s3 }
 0x662   : > { %v2506_v8 = vpop.f32.mrf.mxu0 }
 0x663   : > { %v4898_v11 = vadd.f32 %v4787_v59, %v2506_v8 }
 0x665   : > { %1952 = vrot.lane.b32.xlu0 %v4748_v48, %s4385_s3  ;;  %v2512_v13 = vsel %vm1834_vm8, %v4898_v11, -inf }
 0x669   : > { %2146 = vrot.lane.b32.xlu2 %v4748_v48, %s4388_s26 }
 0x66a   : > { %v2509_v17 = vpop.f32.mrf.mxu0 }
 0x66b   : > { %v4908_v19 = vadd.f32 %v4787_v59, %v2509_v17 }
 0x66d   : > { %2245 = vrot.lane.b32.xlu0 %v4746_v47, %s4383_s30  ;;  %v2515_v21 = vsel %vm1838_vm9, %v4908_v19, -inf }
 0x672   : > { %2051 = vrot.lane.b32.xlu1 %v4746_v47, %s4386_s28 }
 0x67a   : > { %2049 = vrot.lane.b32.xlu1 %v4748_v48, %s4386_s28 }
 0x682   : > { %2148 = vrot.lane.b32.xlu1 %v4746_v47, %s4388_s26 }
 0x68a   : > { %2243 = vrot.lane.b32.xlu1 %v4748_v48, %s4383_s30 }
 0x692   : > { %2419 = vmax.xlane.f32.xlu2 %v2418_v10 }
 0x697   : > { %2513 = vmax.xlane.f32.xlu0 %v2512_v13 }
 0x69a   : > { %2322 = vmax.xlane.f32.xlu2 %v2321_v18 }
 0x69f   : > { %2516 = vmax.xlane.f32.xlu0 %v2515_v21 }
 0x6a2   : > { %2137 = vadd.xlane.f32.xlu2 %v2136_v22 }
 0x6b4   : > { %2319 = vmax.xlane.f32.xlu1 %v2318_v27 }
 0x6bc   : > { %v2223_v36 = vpop.xlane.xlu2 %2222  ;;  %1942 = vadd.xlane.f32.xlu1 %v1941_v35 }
 0x6bd   : > { %v2227_v6 = vsub.f32 %v4862_v53, %v2223_v36  ;;  %v2030_v53 = vsel %vm1838_vm9, %v4950_v51, -inf }
 0x6bf   : > { %v2229_v4 = vmul.f32 1.442695, %v2227_v6 }
 0x6c1   : > { %4034 = vpow2.f32 %v2229_v4 }
 0x6c2   : > { %4036 = vpow2.f32 %v2134_v37 }
 0x6c4   : > { %v1955_v14 = vpop.permute.xlu2 %1954  ;;  %v2226_v41 = vpop.xlane.xlu0 %2225  ;;  %1945 = vadd.xlane.f32.xlu1 %v1944_v40 }
 0x6c5   : > { %v2228_v42 = vsub.f32 %v4867_v56, %v2226_v41  ;;  %3554 = vmatpush.msk.msra.mxu1 %vm1579_vm6, %v1955_v14  ;;  %v2027_v56 = vsel %vm1834_vm8, %v4957_v54, -inf }
 0x6c7   : > { %v4939_v43 = vpop.eup %4034  ;;  %v2231_v44 = vmul.f32 1.442695, %v2228_v42 }
 0x6c8   : > { %v4941_v45 = vpop.eup %4036  ;;  %v2233_v32 = vsel %vm1834_vm8, %v4939_v43, 0.0 }
 0x6c9   : > { %4038 = vpow2.f32 %v2231_v44  ;;  %2234 = vadd.xlane.f32.xlu0 %v2233_v32  ;;  %v2139_v46 = vsel %vm1838_vm9, %v4941_v45, 0.0 }
 0x6cc   : > { %2140 = vadd.xlane.f32.xlu1 %v2139_v46  ;;  %v2417_v57 = vpop.xlane.xlu1 %2416  ;;  %v2147_v63 = vpop.permute.xlu2 %2146 }
 0x6cd   : > { %v2421_v22 = vsub.f32 %v4872_v60, %v2417_v57 }
 0x6cf   : > { %v4947_v50 = vpop.eup %4038 }
 0x6d0   : > { %v2236_v52 = vsel %vm1838_vm9, %v4947_v50, 0.0 }
 0x6d1   : > { %2237 = vadd.xlane.f32.xlu0 %v2236_v52 }
 0x6d4   : > { %2031 = vmax.xlane.f32.xlu1 %v2030_v53 }
 0x6d7   : > { %v1953_v55 = vpop.permute.xlu0 %1952 }
 0x6d8   : > { %1980 = vmatpush.msra.mxu1 %v1953_v55 }
 0x6d9   : > { %2028 = vmax.xlane.f32.xlu0 %v2027_v56 }
 0x6df   : > { %v2246_v59 = vpop.permute.xlu0 %2245 }
 0x6e4   : > { %v2052_v58 = vpop.permute.xlu1 %2051 }
 0x6e5   : > { %3561 = vmatpush.msk.msra.mxu3 %vm1579_vm6, %v2052_v58 }
 0x6ec   : > { %v2050_v61 = vpop.permute.xlu1 %2049 }
 0x6ed   : > { %2439 = vrot.lane.b32.xlu0 %v4746_v47, %s4389_s9  ;;  %2342 = vrot.lane.b32.xlu1 %v4746_v47, %s4387_s13 }
 0x6ee   : > { %2077 = vmatpush.msra.mxu3 %v2050_v61 }
 0x6f0   : > { %3575 = vmatpush.msk.msrb.mxu3 %vm1579_vm6, %v2246_v59 }
 0x6f4   : > { %v2149_v62 = vpop.permute.xlu1 %2148 }
 0x6f5   : > { %3568 = vmatpush.msk.msrb.mxu1 %vm1579_vm6, %v2149_v62 }
 0x6f7   : > { %2174 = vmatpush.msrb.mxu1 %v2147_v63 }
 0x6fc   : > { %v2244_v2 = vpop.permute.xlu1 %2243 }
 0x6fd   : > { %2271 = vmatpush.msrb.mxu3 %v2244_v2 }
 0x705   : > { %v2420_v3 = vpop.xlane.xlu2 %2419 }
 0x706   : > { %v2422_v28 = vsub.f32 %v4893_v5, %v2420_v3 }
 0x708   : > { %v2425_v36 = vmul.f32 1.442695, %v2422_v28 }
 0x70a   : > { %v4969_v10 = vpop.xlane.xlu0 %2513 }
 0x70b   : > { %v2518_v58 = vsub.f32 %v4898_v11, %v4969_v10 }
 0x70d   : > { %v2323_v1 = vpop.xlane.xlu2 %2322  ;;  %v2520_v59 = vmul.f32 1.442695, %v2518_v58  ;;  %v3825_v58 = vld [vmem:[#allocation10 + $0x38] sm:$0xff] }
 0x70e   : > { %v2325_v7 = vsub.f32 %v4901_v12, %v2323_v1  ;;  %2714 = vmatpush.bf16.msra.mxu2 %v3825_v58 }
 0x710   : > { %v2328_v17 = vmul.f32 1.442695, %v2325_v7 }
 0x712   : > { %v2517_v24 = vpop.xlane.xlu0 %2516 }
 0x715   : > { %v2138_v60 = vpop.xlane.xlu2 %2137 }
 0x727   : > { %v2320_v8 = vpop.xlane.xlu1 %2319 }
 0x728   : > { %v2324_v9 = vsub.f32 %v4920_v16, %v2320_v8  ;;  %v2423_v16 = vmul.f32 1.442695, %v2421_v22 }
 0x72a   : > { %v2326_v13 = vmul.f32 1.442695, %v2324_v9 }
 0x72c   : > { %4040 = vpow2.f32 %v2326_v13 }
 0x72f   : > { %v1943_v18 = vpop.xlane.xlu1 %1942 }
 0x730   : > { %4042 = vrcp.f32 %v1943_v18 }
 0x731   : > { %4044 = vpow2.f32 %v2328_v17 }
 0x732   : > { %v4972_v21 = vpop.eup %4040 }
 0x733   : > { %v2330_v23 = vsel %vm1834_vm8, %v4972_v21, 0.0 }
 0x734   : > { %2331 = vadd.xlane.f32.xlu2 %v2330_v23 }
 0x736   : > { %v4043_v15 = vpop.eup %4042 }
 0x737   : > { %v1949_v26 = vmul.f32 %v4043_v15, %v4925_v33  ;;  %v1946_v12 = vpop.xlane.xlu1 %1945  ;;  %v4978_v27 = vpop.eup %4044 }
 0x738   : > { %4046 = vrcp.f32 %v1946_v12  ;;  %v2333_v31 = vsel %vm1838_vm9, %v4978_v27, 0.0 }
 0x739   : > { %3555 = vmatmul.msk.f32.vlgmr.msra.gmra.mxu1 %vm1834_vm8, %v1949_v26  ;;  %4048 = vpow2.f32 %v2423_v16 }
 0x73a   : > { %4050 = vrcp.f32 %v2138_v60 }
 0x73b   : > { %4052 = vpow2.f32 %v2425_v36 }
 0x73c   : > { %v4984_v0 = vpop.xlane.xlu0 %2234  ;;  %2334 = vadd.xlane.f32.xlu2 %v2333_v31 }
 0x73e   : > { %v4047_v35 = vpop.eup %4046 }
 0x73f   : > { %v2141_v33 = vpop.xlane.xlu1 %2140  ;;  %v1950_v6 = vmul.f32 %v4047_v35, %v4933_v38  ;;  %v4987_v37 = vpop.eup %4048 }
 0x740   : > { %v2427_v5 = vsel %vm1834_vm8, %v4987_v37, 0.0  ;;  %v4051_v4 = vpop.eup %4050  ;;  %4054 = vrcp.f32 %v2141_v33 }
 0x741   : > { %3556 = vmatmul.msk.f32.gmra.mxu1 %vm1834_vm8, %v1950_v6  ;;  %v2144_v40 = vmul.f32 %v4051_v4, %v4910_v20  ;;  %v4995_v41 = vpop.eup %4052 }
 0x742   : > { %v2430_v44 = vsel %vm1838_vm9, %v4995_v41, 0.0 }
 0x744   : > { %v4992_v39 = vpop.xlane.xlu0 %2237  ;;  %2428 = vadd.xlane.f32.xlu2 %v2427_v5 }
 0x746   : > { %v4055_v32 = vpop.eup %4054 }
 0x747   : > { %v2032_v14 = vpop.xlane.xlu1 %2031  ;;  %v2145_v20 = vmul.f32 %v4055_v32, %v4941_v45  ;;  %v2519_v45 = vsub.f32 %v4908_v19, %v2517_v24 }
 0x748   : > { %v2034_v38 = vsub.f32 %v4950_v51, %v2032_v14 }
 0x749   : > { %3569 = vmatmul.msk.f32.vlgmr.msrb.gmra.mxu1 %vm1834_vm8, %v2144_v40 }
 0x74a   : > { %v2037_v42 = vmul.f32 1.442695, %v2034_v38 }
 0x74c   : > { %4056 = vpow2.f32 %v2037_v42  ;;  %v2029_v46 = vpop.xlane.xlu0 %2028  ;;  %2431 = vadd.xlane.f32.xlu2 %v2430_v44 }
 0x74d   : > { %v2033_v49 = vsub.f32 %v4957_v54, %v2029_v46  ;;  %v2522_v54 = vmul.f32 1.442695, %v2519_v45 }
 0x74f   : > { %v2035_v52 = vmul.f32 1.442695, %v2033_v49 }
 0x751   : > { %4058 = vpow2.f32 %v2035_v52  ;;  %3570 = vmatmul.msk.f32.gmra.mxu1 %vm1834_vm8, %v2145_v20 }
 0x752   : > { %v4057_v53 = vpop.eup %4056  ;;  %4060 = vpow2.f32 %v2522_v54 }
 0x753   : > { %v2042_v51 = vsel %vm1838_vm9, %v4057_v53, 0.0  ;;  %4062 = vpow2.f32 %v2520_v59  ;;  %v3823_v59 = vld [vmem:[#allocation10 + $0x28] sm:$0xff] }
 0x754   : > { %2043 = vadd.xlane.f32.xlu0 %v2042_v51 }
 0x757   : > { %v4059_v55 = vpop.eup %4058 }
 0x758   : > { %v2039_v56 = vsel %vm1834_vm8, %v4059_v55, 0.0  ;;  %v5018_v61 = vpop.eup %4060 }
 0x759   : > { %2040 = vadd.xlane.f32.xlu1 %v2039_v56  ;;  %v2527_v62 = vsel %vm1838_vm9, %v5018_v61, 0.0 }
 0x75f   : > { %v2343_v57 = vpop.permute.xlu1 %2342  ;;  %v2440_v9 = vpop.permute.xlu0 %2439 }
 0x760   : > { %3582 = vmatpush.msk.msra.mxu1 %vm1579_vm6, %v2343_v57 }
 0x764   : > { %2437 = vrot.lane.b32.xlu2 %v4748_v48, %s4389_s9 }
 0x768   : > { %2536 = vrot.lane.b32.xlu0 %v4746_v47, %s4390_s27  ;;  %v5022_v47 = vpop.eup %4062 }
 0x76c   : > { %2534 = vrot.lane.b32.xlu2 %v4748_v48, %s4390_s27 }
 0x772   : > { %2340 = vrot.lane.b32.xlu1 %v4748_v48, %s4387_s13  ;;  %v2524_v48 = vsel %vm1834_vm8, %v5022_v47, 0.0 }
 0x792   : > { %2528 = vadd.xlane.f32.xlu0 %v2527_v62  ;;  %v3822_v62 = vld [vmem:[#allocation10 + $0x20] sm:$0xff] }
 0x79c   : > { %2525 = vadd.xlane.f32.xlu1 %v2524_v48  ;;  %v3820_v48 = vld [vmem:[#allocation10 + $0x10] sm:$0xff] }
 0x7a7   : > { %v2332_v19 = vpop.xlane.xlu2 %2331 }
 0x7af   : > { %v2335_v2 = vpop.xlane.xlu2 %2334 }
 0x7b6   : > { %v1982_v63 = vpop.f32.mrf.mxu1 }
 0x7b7   : > { %v2429_v11 = vpop.xlane.xlu2 %2428 }
 0x7be   : > { %v1985_v3 = vpop.f32.mrf.mxu1 }
 0x7bf   : > { %v3971_v1 = vpack.i.bf16 %v1985_v3, %v1982_v63  ;;  %v2432_v7 = vpop.xlane.xlu2 %2431  ;;  %v3818_v63 = vld [vmem:[#allocation10] sm:$0xff] }
 0x7c1   : > { %3972 = vrot.lane.b32.xlu1 %v3971_v1, %s4390_s27 }
 0x7c6   : > { %v2176_v8 = vpop.f32.mrf.mxu1 }
 0x7c7   : > { %v2044_v18 = vpop.xlane.xlu0 %2043  ;;  %v2438_v24 = vpop.permute.xlu2 %2437 }
 0x7cc   : > { %v2041_v10 = vpop.xlane.xlu1 %2040 }
 0x7cd   : > { %4064 = vrcp.f32 %v2041_v10 }
 0x7ce   : > { %v2179_v13 = vpop.f32.mrf.mxu1  ;;  %4066 = vrcp.f32 %v2044_v18 }
 0x7cf   : > { %v3976_v17 = vpack.i.bf16 %v2179_v13, %v2176_v8  ;;  %4068 = vrcp.f32 %v4984_v0  ;;  %v2535_v36 = vpop.permute.xlu2 %2534 }
 0x7d0   : > { %4070 = vrcp.f32 %v2332_v19  ;;  %v3819_v19 = vld [vmem:[#allocation10 + $0x8] sm:$0xff] }
 0x7d1   : > { %3977 = vrot.lane.b32.xlu2 %v3976_v17, %s4387_s13  ;;  %4072 = vrcp.f32 %v4992_v39 }
 0x7d2   : > { %4074 = vrcp.f32 %v2335_v2 }
 0x7d3   : > { %v4065_v22 = vpop.eup %4064  ;;  %4076 = vrcp.f32 %v2429_v11 }
 0x7d4   : > { %v2047_v23 = vmul.f32 %v4065_v22, %v4059_v55  ;;  %v4067_v15 = vpop.eup %4066  ;;  %4078 = vrcp.f32 %v2432_v7 }
 0x7d5   : > { %v2048_v16 = vmul.f32 %v4067_v15, %v4057_v53  ;;  %v4069_v26 = vpop.eup %4068 }
 0x7d6   : > { %3562 = vmatmul.msk.f32.vlgmr.msra.gmra.mxu3 %vm1834_vm8, %v2047_v23  ;;  %v4071_v12 = vpop.eup %4070  ;;  %v2241_v28 = vmul.f32 %v4069_v26, %v4939_v43 }
 0x7d7   : > { %3589 = vmatpush.msk.msra.mxu3 %vm1579_vm6, %v2440_v9  ;;  %v2338_v60 = vmul.f32 %v4071_v12, %v4972_v21  ;;  %v4073_v0 = vpop.eup %4072 }
 0x7d8   : > { %v4075_v33 = vpop.eup %4074  ;;  %v2242_v6 = vmul.f32 %v4073_v0, %v4947_v50 }
 0x7d9   : > { %2465 = vmatpush.msra.mxu3 %v2438_v24  ;;  %v2339_v43 = vmul.f32 %v4075_v33, %v4978_v27  ;;  %v4077_v21 = vpop.eup %4076 }
 0x7da   : > { %v2537_v35 = vpop.permute.xlu0 %2536  ;;  %v2435_v5 = vmul.f32 %v4077_v21, %v4987_v37  ;;  %v4079_v4 = vpop.eup %4078 }
 0x7db   : > { %v2436_v39 = vmul.f32 %v4079_v4, %v4995_v41 }
 0x7de   : > { %3563 = vmatmul.msk.f32.gmra.mxu3 %vm1834_vm8, %v2048_v16 }
 0x7e4   : > { %v2341_v31 = vpop.permute.xlu1 %2340 }
 0x7e5   : > { %2368 = vmatpush.msra.mxu1 %v2341_v31 }
 0x7e6   : > { %3576 = vmatmul.msk.f32.vlgmr.msrb.gmra.mxu3 %vm1834_vm8, %v2241_v28  ;;  %3583 = vmatmul.msk.f32.vlgmr.msra.gmra.mxu1 %vm1834_vm8, %v2338_v60 }
 0x7e7   : > { %3596 = vmatpush.msk.msrb.mxu1 %vm1579_vm6, %v2537_v35 }
 0x7e9   : > { %2562 = vmatpush.msrb.mxu1 %v2535_v36 }
 0x7ee   : > { %3577 = vmatmul.msk.f32.gmra.mxu3 %vm1834_vm8, %v2242_v6  ;;  %3584 = vmatmul.msk.f32.gmra.mxu1 %vm1834_vm8, %v2339_v43 }
 0x7f6   : > { %3590 = vmatmul.msk.f32.vlgmr.msra.gmra.mxu3 %vm1834_vm8, %v2435_v5 }
 0x7fe   : > { %3591 = vmatmul.msk.f32.gmra.mxu3 %vm1834_vm8, %v2436_v39 }
 0x805   : > { %v2529_v50 = vpop.xlane.xlu0 %2528 }
 0x80f   : > { %v2526_v40 = vpop.xlane.xlu1 %2525 }
 0x810   : > { %4080 = vrcp.f32 %v2526_v40 }
 0x811   : > { %4082 = vrcp.f32 %v2529_v50 }
 0x816   : > { %v4081_v14 = vpop.eup %4080 }
 0x817   : > { %v2532_v27 = vmul.f32 %v4081_v14, %v5022_v47  ;;  %v4083_v38 = vpop.eup %4082  ;;  %v3821_v47 = vld [vmem:[#allocation10 + $0x18] sm:$0xff] }
 0x818   : > { %v2533_v42 = vmul.f32 %v4083_v38, %v5018_v61  ;;  %v3824_v61 = vld [vmem:[#allocation10 + $0x30] sm:$0xff] }
 0x819   : > { %3597 = vmatmul.msk.f32.vlgmr.msrb.gmra.mxu1 %vm1834_vm8, %v2532_v27  ;;  %2715 = vmatpush.bf16.msra.mxu2 %v3824_v61  ;;  %v4014_v27 = vld [vmem:[%s5131_s16] ss:$0 sm:$0xff] }
 0x81d   : > { %2716 = vmatpush.bf16.msra.mxu2 %v3823_v59 }
 0x821   : > { %3598 = vmatmul.msk.f32.gmra.mxu1 %vm1834_vm8, %v2533_v42  ;;  %2717 = vmatpush.bf16.msra.mxu2 %v3822_v62 }
 0x825   : > { %2718 = vmatpush.bf16.msra.mxu2 %v3821_v47  ;;  %v3689_v47 = vld [vmem:[#allocation12 + $0x70] sm:$0xf] }
 0x829   : > { %2719 = vmatpush.bf16.msra.mxu2 %v3820_v48  ;;  %v3841_v48 = vld [vmem:[#allocation12 + $0x74] sm:$0xf0] }
 0x82b   : > { %v3978_v2 = vpop.permute.xlu2 %3977 }
 0x82c   : > { %v3980_v16 = vunpack.i.h.bf16 %v3978_v2  ;;  %v3979_v26 = vunpack.i.l.bf16 %v3978_v2  ;;  %v3691_v2 = vld [vmem:[#allocation12 + $0x78] sm:$0xf0] }
 0x82d   : > { %2720 = vmatpush.bf16.msra.mxu2 %v3819_v19  ;;  %v3840_v19 = vld [vmem:[#allocation12 + $0x74] sm:$0xf] }
 0x831   : > { %2721 = vmatpush.bf16.msra.mxu2 %v3818_v63  ;;  %v3690_v63 = vor.u32 %v3841_v48, %v3689_v47  ;;  %v3855_v47 = vld [vmem:[#allocation13 + $0x68] sm:$0xff] }
 0x832   : > { %v3847_v48 = vld [vmem:[#allocation13 + $0x28] sm:$0xff] }
 0x833   : > { %v3973_v1 = vpop.permute.xlu1 %3972  ;;  %2894 = vmatpush.bf16.msrb.mxu3 %v3690_v63 }
 0x834   : > { %v3975_v11 = vunpack.i.h.bf16 %v3973_v1  ;;  %v3974_v8 = vunpack.i.l.bf16 %v3973_v1  ;;  %v3681_v1 = vld [vmem:[#allocation12 + $0x60] sm:$0xf] }
 0x836   : > { %v2627_v17 = vsel %vm1798_vm7, %v4927_v34, %v3975_v11  ;;  %v2626_v18 = vsel %vm1798_vm7, %v4917_v25, %v3974_v8  ;;  %v3839_v11 = vld [vmem:[#allocation12 + $0x64] sm:$0xf0]  ;;  %v3838_v8 = vld [vmem:[#allocation12 + $0x64] sm:$0xf] }
 0x859   : > { %v2079_v37 = vpop.f32.mrf.mxu3 }
 0x861   : > { %v2082_v44 = vpop.f32.mrf.mxu3 }
 0x862   : > { %v3986_v32 = vpack.i.bf16 %v2082_v44, %v2079_v37 }
 0x863   : > { %v2370_v41 = vpop.f32.mrf.mxu1 }
 0x864   : > { %3987 = vrot.lane.b32.xlu2 %v3986_v32, %s4389_s9 }
 0x869   : > { %v2273_v46 = vpop.f32.mrf.mxu3 }
 0x86b   : > { %v2373_v49 = vpop.f32.mrf.mxu1 }
 0x86c   : > { %v3981_v52 = vpack.i.bf16 %v2373_v49, %v2370_v41  ;;  %v4391_v49 = vmov 128.0  }
 0x86d   : > { %4084 = vrcp.f32 %v4391_v49  ;;  %v3635_v49 = vld [vmem:[#allocation12 + $0x8] sm:$0xf0] }
 0x86e   : > { %3982 = vrot.lane.b32.xlu0 %v3981_v52, %s4388_s26  ;;  %s3761_s26 = sshll.u32 %s5176_s2, 4 }
 0x871   : > { %v2276_v20 = vpop.f32.mrf.mxu3 }
 0x872   : > { %v3991_v53 = vpack.i.bf16 %v2276_v20, %v2273_v46 }
 0x873   : > { %v4085_v52 = vpop.eup %4084 }
 0x874   : > { %3992 = vrot.lane.b32.xlu2 %v3991_v53, %s4383_s30  ;;  %v2738_v20 = vmul.f32 128.0, %v4085_v52  ;;  %vm2742_vm15 = vweird.f32 %v4085_v52  ;;  %s5173_s30 = sld [smem:[#allocation34_spill]] }
 0x876   : > { %v2739_v53 = vsub.f32 1.0, %v2738_v20 }
 0x879   : > { %v2467_v51 = vpop.f32.mrf.mxu3 }
 0x87a   : > { %s908_s7 = scalar_lea.vmem %s5173_s30, %s3761_s26 }
 0x881   : > { %v2470_v55 = vpop.f32.mrf.mxu3 }
 0x882   : > { %v3996_v56 = vpack.i.bf16 %v2470_v55, %v2467_v51  ;;  %v2740_v51 = vmul.f32 %v4085_v52, %v2739_v53  ;;  %v3857_v53 = vld [vmem:[#allocation13 + $0x78] sm:$0xff] }
 0x883   : > { %3074 = vmatpush.bf16.msrb.mxu2 %v3857_v53 }
 0x884   : > { %3997 = vrot.lane.b32.xlu2 %v3996_v56, %s4386_s28  ;;  %v2741_v55 = vadd.f32 %v4085_v52, %v2740_v51  ;;  %v3849_v51 = vld [vmem:[#allocation13 + $0x38] sm:$0xff] }
 0x885   : > { %3060 = vmatpush.bf16.msra.mxu1 %v3849_v51 }
 0x886   : > { %v5067_v56 = vsel %vm2742_vm15, %v4085_v52, %v2741_v55 }
 0x896   : > { %v2564_v57 = vpop.f32.mrf.mxu1 }
 0x89e   : > { %v2567_v45 = vpop.f32.mrf.mxu1 }
 0x89f   : > { %v4001_v54 = vpack.i.bf16 %v2567_v45, %v2564_v57 }
 0x8a1   : > { %4002 = vrot.lane.b32.xlu1 %v4001_v54, %s4385_s3 }
 0x8be   : > { %v3988_v3 = vpop.permute.xlu2 %3987 }
 0x8bf   : > { %v3990_v10 = vunpack.i.h.bf16 %v3988_v3  ;;  %v3989_v7 = vunpack.i.l.bf16 %v3988_v3  ;;  %v3694_v3 = vor.u32 %v3840_v19, %v3691_v2  ;;  %v3854_v2 = vld [vmem:[#allocation13 + $0x60] sm:$0xff] }
 0x8c1   : > { %v2629_v22 = vsel %vm2628_vm10, %v2626_v18, %v3989_v7  ;;  %v2630_v23 = vsel %vm2628_vm10, %v2627_v17, %v3990_v10  ;;  %2908 = vmatpush.bf16.msra.mxu0 %v3694_v3  ;;  %v3683_v10 = vld [vmem:[#allocation12 + $0x68] sm:$0xf0]  ;;  %v3837_v17 = vld [vmem:[#allocation12 + $0x54] sm:$0xf0]  ;;  %v3836_v18 = vld [vmem:[#allocation12 + $0x54] sm:$0xf] }
 0x8c2   : > { %v2632_v60 = vsel %vm2631_vm11, %v2629_v22, %v3979_v26  ;;  %v2633_v31 = vsel %vm2631_vm11, %v2630_v23, %v3980_v16  ;;  %v3686_v7 = vor.u32 %v3838_v8, %v3683_v10  ;;  %v3675_v23 = vld [vmem:[#allocation12 + $0x58] sm:$0xf0]  ;;  %v3835_v16 = vld [vmem:[#allocation12 + $0x44] sm:$0xf0]  ;;  %v3834_v26 = vld [vmem:[#allocation12 + $0x44] sm:$0xf] }
 0x8c5   : > { %2909 = vmatpush.bf16.msra.mxu0 %v3686_v7 }
 0x8ce   : > { %v3993_v9 = vpop.permute.xlu2 %3992 }
 0x8cf   : > { %v3995_v24 = vunpack.i.h.bf16 %v3993_v9  ;;  %v3994_v15 = vunpack.i.l.bf16 %v3993_v9  ;;  %v3682_v9 = vor.u32 %v3839_v11, %v3681_v1 }
 0x8d1   : > { %v2634_v0 = vsel %vm1233_vm5, %v2632_v60, %v3994_v15  ;;  %v2635_v34 = vsel %vm1233_vm5, %v2633_v31, %v3995_v24  ;;  %2895 = vmatpush.bf16.msrb.mxu3 %v3682_v9  ;;  %v3678_v24 = vor.u32 %v3836_v18, %v3675_v23  ;;  %v3665_v15 = vld [vmem:[#allocation12 + $0x40] sm:$0xf]  ;;  %v3657_v31 = vld [vmem:[#allocation12 + $0x30] sm:$0xf] }
 0x8d3   : > { %2910 = vmatpush.bf16.msra.mxu0 %v3678_v24 }
 0x8de   : > { %v3998_v35 = vpop.permute.xlu2 %3997 }
 0x8df   : > { %v4000_v25 = vunpack.i.h.bf16 %v3998_v35  ;;  %v3999_v6 = vunpack.i.l.bf16 %v3998_v35  ;;  %v3833_v35 = vld [vmem:[#allocation12 + $0x34] sm:$0xf0] }
 0x8e0   : > { %v3983_v13 = vpop.permute.xlu0 %3982 }
 0x8e1   : > { %v3985_v12 = vunpack.i.h.bf16 %v3983_v13  ;;  %v3984_v28 = vunpack.i.l.bf16 %v3983_v13  ;;  %v3673_v13 = vld [vmem:[#allocation12 + $0x50] sm:$0xf] }
 0x8e2   : > { %v3674_v22 = vor.u32 %v3837_v17, %v3673_v13  ;;  %v4015_v17 = vld [vmem:[%s5132_s17] ss:$0 sm:$0xff] }
 0x8e3   : > { %v2637_v36 = vsel %vm2636_vm12, %v2634_v0, %v3984_v28  ;;  %v2638_v33 = vsel %vm2636_vm12, %v2635_v34, %v3985_v12  ;;  %v3666_v12 = vor.u32 %v3835_v16, %v3665_v15  ;;  %v3667_v28 = vld [vmem:[#allocation12 + $0x48] sm:$0xf0]  ;;  %v3832_v0 = vld [vmem:[#allocation12 + $0x34] sm:$0xf]  ;;  %v3658_v34 = vor.u32 %v3833_v35, %v3657_v31  ;;  %v4016_v15 = vld [vmem:[%s5133_s18] ss:$0 sm:$0xff] }
 0x8e4   : > { %v2640_v4 = vsel %vm2639_vm13, %v2637_v36, %v3999_v6  ;;  %v2641_v39 = vsel %vm2639_vm13, %v2638_v33, %v4000_v25  ;;  %2896 = vmatpush.bf16.msrb.mxu3 %v3674_v22  ;;  %v3670_v60 = vor.u32 %v3834_v26, %v3667_v28  ;;  %v3659_v36 = vld [vmem:[#allocation12 + $0x38] sm:$0xf0]  ;;  %v3649_v25 = vld [vmem:[#allocation12 + $0x20] sm:$0xf]  ;;  %v3831_v6 = vld [vmem:[#allocation12 + $0x24] sm:$0xf0] }
 0x8e5   : > { %v3662_v33 = vor.u32 %v3832_v0, %v3659_v36  ;;  %v3852_v31 = vld [vmem:[#allocation13 + $0x50] sm:$0xff]  ;;  %v3845_v35 = vld [vmem:[#allocation13 + $0x18] sm:$0xff]  ;;  %v3843_v36 = vld [vmem:[#allocation13 + $0x8] sm:$0xff] }
 0x8e6   : > { %2911 = vmatpush.bf16.msra.mxu0 %v3670_v60  ;;  %v3846_v60 = vld [vmem:[#allocation13 + $0x20] sm:$0xff]  ;;  %v3844_v0 = vld [vmem:[#allocation13 + $0x10] sm:$0xff] }
 0x8e8   : > { %2897 = vmatpush.bf16.msrb.mxu3 %v3666_v12 }
 0x8ea   : > { %2912 = vmatpush.bf16.msra.mxu0 %v3662_v33  ;;  %v3842_v33 = vld [vmem:[#allocation13] sm:$0xff] }
 0x8ec   : > { %2898 = vmatpush.bf16.msrb.mxu3 %v3658_v34  ;;  %v3850_v34 = vld [vmem:[#allocation13 + $0x40] sm:$0xff] }
 0x913   : > { %v4003_v43 = vpop.permute.xlu1 %4002 }
 0x914   : > { %v4005_v21 = vunpack.i.h.bf16 %v4003_v43  ;;  %v4004_v5 = vunpack.i.l.bf16 %v4003_v43  ;;  %v3830_v43 = vld [vmem:[#allocation12 + $0x24] sm:$0xf] }
 0x916   : > { %v2643_v40 = vsel %vm2642_vm14, %v2640_v4, %v4004_v5  ;;  %v2644_v50 = vsel %vm2642_vm14, %v2641_v39, %v4005_v21  ;;  %v3650_v21 = vor.u32 %v3831_v6, %v3649_v25  ;;  %v3651_v5 = vld [vmem:[#allocation12 + $0x28] sm:$0xf0]  ;;  %v2808_v25 = vld [vmem:[%s5135_s20] sm:$0x3] }
 0x917   : > { %v2645_v14 = vpack.c.bf16 %v2644_v50, %v2643_v40  ;;  %v3654_v4 = vor.u32 %v3830_v43, %v3651_v5  ;;  %v3641_v50 = vld [vmem:[#allocation12 + $0x10] sm:$0xf]  ;;  %v2811_v43 = vperm.slane %v2808_v25, 1 }
 0x918   : > { %2899 = vmatpush.bf16.msrb.mxu3 %v3650_v21 }
 0x919   : > { %2722 = vmatmul.bf16.vlgmr.msra.gmra.mxu2 %v2645_v14  ;;  %2913 = vmatpush.bf16.msra.mxu0 %v3654_v4  ;;  %v3829_v14 = vld [vmem:[#allocation12 + $0x14] sm:$0xf0] }
 0x99c   : > { %v2723_v38 = vpop.f32.mrf.mxu2 }
 0x99d   : > { %v2724_v42 = vadd.f32 %v4014_v27, %v2723_v38  ;;  %v3642_v38 = vor.u32 %v3829_v14, %v3641_v50 }
 0x99f   : > { %v2728_v37 = vadd.f32 %v2724_v42, %v4719_v30  ;;  %v3643_v42 = vld [vmem:[#allocation12 + $0x18] sm:$0xf0]  ;;  %2900 = vmatpush.bf16.msrb.mxu3 %v3642_v38 }
 0x9a1   : > { %2732 = vadd.xlane.f32.xlu1 %v2728_v37 }
 0x9a4   : > { %v2725_v44 = vpop.f32.mrf.mxu2 }
 0x9a5   : > { %v2726_v32 = vadd.f32 %v4014_v27, %v2725_v44  ;;  %v3828_v27 = vld [vmem:[#allocation12 + $0x14] sm:$0xf]  ;;  %v3827_v44 = vld [vmem:[#allocation12 + $0x4] sm:$0xf0] }
 0x9a7   : > { %v2729_v41 = vadd.f32 %v2726_v32, %v4715_v29 }
 0x9a9   : > { %v2734_v46 = vsel %vm1579_vm6, %v2729_v41, 0.0 }
 0x9aa   : > { %2735 = vadd.xlane.f32.xlu2 %v2734_v46  ;;  %v3826_v46 = vld [vmem:[#allocation12 + $0x4] sm:$0xf] }
 0x9ab   : > { %v3638_v20 = vor.u32 %v3826_v46, %v3635_v49  ;;  %v4017_v46 = vld [vmem:[%s5137_s22] ss:$0 sm:$0xff] }
 0xa14   : > { %v2733_v57 = vpop.xlane.xlu1 %2732 }
 0xa15   : > { %v2744_v30 = vmul.f32 %v5067_v56, %v2733_v57 }
 0xa17   : > { %v5070_v45 = vsub.f32 %v2728_v37, %v2744_v30  ;;  %v3633_v37 = vld [vmem:[#allocation12] sm:$0xf] }
 0xa18   : > { %v3634_v52 = vor.u32 %v3827_v44, %v3633_v37 }
 0xa19   : > { %v2748_v29 = vmul.f32 %v5070_v45, %v5070_v45 }
 0xa1a   : > { %2901 = vmatpush.bf16.msrb.mxu3 %v3634_v52 }
 0xa1b   : > { %2750 = vadd.xlane.f32.xlu0 %v2748_v29  ;;  %v3856_v29 = vld [vmem:[#allocation13 + $0x70] sm:$0xff] }
 0xa1c   : > { %3075 = vmatpush.bf16.msrb.mxu2 %v3856_v29 }
 0xa1d   : > { %v2736_v54 = vpop.xlane.xlu2 %2735 }
 0xa1e   : > { %v2745_v58 = vmul.f32 %v5067_v56, %v2736_v54  ;;  %v3848_v54 = vld [vmem:[#allocation13 + $0x30] sm:$0xff] }
 0xa1f   : > { %3061 = vmatpush.bf16.msra.mxu1 %v3848_v54 }
 0xa20   : > { %v5075_v61 = vsub.f32 %v2729_v41, %v2745_v58  ;;  %v3646_v41 = vor.u32 %v3828_v27, %v3643_v42  ;;  %3076 = vmatpush.bf16.msrb.mxu2 %v3855_v47 }
 0xa22   : > { %v2749_v59 = vmul.f32 %v5075_v61, %v5075_v61  ;;  %2914 = vmatpush.bf16.msra.mxu0 %v3646_v41 }
 0xa23   : > { %3062 = vmatpush.bf16.msra.mxu1 %v3847_v48 }
 0xa24   : > { %v2752_v62 = vsel %vm1579_vm6, %v2749_v59, 0.0  ;;  %3077 = vmatpush.bf16.msrb.mxu2 %v3854_v2 }
 0xa25   : > { %2753 = vadd.xlane.f32.xlu2 %v2752_v62 }
 0xa26   : > { %2915 = vmatpush.bf16.msra.mxu0 %v3638_v20 }
 0xa27   : > { %3063 = vmatpush.bf16.msra.mxu1 %v3846_v60 }
 0xa2b   : > { %3064 = vmatpush.bf16.msra.mxu1 %v3845_v35 }
 0xa2f   : > { %3065 = vmatpush.bf16.msra.mxu1 %v3844_v0 }
 0xa33   : > { %3066 = vmatpush.bf16.msra.mxu1 %v3843_v36 }
 0xa37   : > { %3067 = vmatpush.bf16.msra.mxu1 %v3842_v33 }
 0xa8e   : > { %v2751_v39 = vpop.xlane.xlu0 %2750 }
 0xa8f   : > { %v2755_v40 = vmul.f32 %v2751_v39, %v5067_v56  ;;  %v2810_v39 = vperm.slane %v2808_v25, 0 }
 0xa91   : > { %v2757_v32 = vadd.f32 1e-05, %v2755_v40 }
 0xa93   : > { %4086 = vrsqrt.f32 %v2757_v32  ;;  %vm2765_vm1 = vweird.f32 %v2757_v32 }
 0xa98   : > { %v2754_v55 = vpop.xlane.xlu2 %2753 }
 0xa99   : > { %v4087_v57 = vpop.eup %4086  ;;  %v2756_v30 = vmul.f32 %v2754_v55, %v5067_v56 }
 0xa9a   : > { %v2760_v58 = vmul.f32 %v4087_v57, %v2757_v32  ;;  %vm2766_vm0 = vweird.f32 %v4087_v57 }
 0xa9b   : > { %v2758_v59 = vadd.f32 1e-05, %v2756_v30  ;;  %vm2767_vm2 = vmor %vm2765_vm1, %vm2766_vm0 }
 0xa9c   : > { %v2761_v62 = vmul.f32 %v4087_v57, %v2760_v58 }
 0xa9d   : > { %4088 = vrsqrt.f32 %v2758_v59  ;;  %vm2775_vm4 = vweird.f32 %v2758_v59 }
 0xa9e   : > { %v2762_v19 = vmul.f32 0.5, %v2761_v62 }
 0xaa0   : > { %v2763_v63 = vsub.f32 1.5, %v2762_v19 }
 0xaa2   : > { %v2764_v1 = vmul.f32 %v4087_v57, %v2763_v63 }
 0xaa3   : > { %v4089_v3 = vpop.eup %4088 }
 0xaa4   : > { %v2770_v11 = vmul.f32 %v4089_v3, %v2758_v59  ;;  %v2768_v9 = vsel %vm2767_vm2, %v4087_v57, %v2764_v1  ;;  %vm2776_vm3 = vweird.f32 %v4089_v3 }
 0xaa5   : > { %v2779_v13 = vmul.f32 %v2768_v9, %v5070_v45  ;;  %vm2777_vm5 = vmor %vm2775_vm4, %vm2776_vm3  ;;  %v3853_v45 = vld [vmem:[#allocation13 + $0x58] sm:$0xff] }
 0xaa6   : > { %v2771_v8 = vmul.f32 %v4089_v3, %v2770_v11  ;;  %3078 = vmatpush.bf16.msrb.mxu2 %v3853_v45 }
 0xaa7   : > { %v2784_v24 = vmul.f32 %v4015_v17, %v2779_v13 }
 0xaa8   : > { %v2772_v10 = vmul.f32 0.5, %v2771_v8 }
 0xaa9   : > { %v2789_v26 = vadd.f32 %v4016_v15, %v2784_v24 }
 0xaaa   : > { %v2773_v7 = vsub.f32 1.5, %v2772_v10  ;;  %3079 = vmatpush.bf16.msrb.mxu2 %v3852_v31 }
 0xaac   : > { %v2774_v18 = vmul.f32 %v4089_v3, %v2773_v7 }
 0xaae   : > { %v2778_v22 = vsel %vm2777_vm5, %v4089_v3, %v2774_v18 }
 0xaaf   : > { %v2780_v23 = vmul.f32 %v2778_v22, %v5075_v61  ;;  %v3851_v61 = vld [vmem:[#allocation13 + $0x48] sm:$0xff] }
 0xab0   : > { %3080 = vmatpush.bf16.msrb.mxu2 %v3851_v61 }
 0xab1   : > { %v2785_v16 = vmul.f32 %v4015_v17, %v2780_v23 }
 0xab3   : > { %v2790_v12 = vadd.f32 %v4016_v15, %v2785_v16 }
 0xab4   : > { %3081 = vmatpush.bf16.msrb.mxu2 %v3850_v34 }
 0xab5   : > { %v2791_v28 = vpack.c.bf16 %v2790_v12, %v2789_v26 }
 0xab7   : > { %2902 = vmatmul.bf16.vlgmr.msrb.gmra.mxu3 %v2791_v28  ;;  %2916 = vmatmul.bf16.vlgmr.msra.gmra.mxu0 %v2791_v28 }
 0xb34   : > { %v2917_v6 = vpop.f32.mrf.mxu0 }
 0xb35   : > { %v2918_v5 = vadd.f32 %v2917_v6, %v2811_v43 }
 0xb37   : > { %v2923_v50 = vmax.f32 %v2918_v5, 0.0 }
 0xb3a   : > { %v2903_v21 = vpop.f32.mrf.mxu3 }
 0xb3b   : > { %v2904_v27 = vadd.f32 %v2903_v21, %v2810_v39 }
 0xb3c   : > { %v2919_v4 = vpop.f32.mrf.mxu0 }
 0xb3d   : > { %v2920_v40 = vadd.f32 %v2919_v4, %v2811_v43  ;;  %v2922_v44 = vmax.f32 %v2904_v27, 0.0 }
 0xb3f   : > { %v2925_v14 = vmax.f32 %v2920_v40, 0.0 }
 0xb41   : > { %v2927_v38 = vpack.c.bf16 %v2925_v14, %v2923_v50 }
 0xb42   : > { %v2905_v42 = vpop.f32.mrf.mxu3 }
 0xb43   : > { %v2906_v37 = vadd.f32 %v2905_v42, %v2810_v39  ;;  %3082 = vmatmul.bf16.vlgmr.msrb.gmra.mxu2 %v2927_v38 }
 0xb45   : > { %v2924_v32 = vmax.f32 %v2906_v37, 0.0 }
 0xb47   : > { %v2926_v41 = vpack.c.bf16 %v2924_v32, %v2922_v44 }
 0xb49   : > { %3068 = vmatmul.bf16.vlgmr.msra.gmra.mxu1 %v2926_v41 }
 0xbc6   : > { %v3069_v49 = vpop.f32.mrf.mxu1  ;;  %v3083_v52 = vpop.f32.mrf.mxu2 }
 0xbc7   : > { %v3070_v20 = vadd.f32 %v4017_v46, %v3069_v49 }
 0xbc9   : > { %v3084_v53 = vadd.f32 %v3083_v52, %v3070_v20 }
 0xbcb   : > { %v3088_v51 = vadd.f32 %v3084_v53, %v2789_v26  ;;  %v4018_v26 = vld [vmem:[%s5138_s23] ss:$0 sm:$0xff] }
 0xbcd   : > { %3092 = vadd.xlane.f32.xlu2 %v3088_v51 }
 0xbce   : > { %v3071_v55 = vpop.f32.mrf.mxu1  ;;  %v3085_v30 = vpop.f32.mrf.mxu2 }
 0xbcf   : > { %v3072_v57 = vadd.f32 %v4017_v46, %v3071_v55 }
 0xbd1   : > { %v3086_v29 = vadd.f32 %v3085_v30, %v3072_v57 }
 0xbd3   : > { %v3089_v54 = vadd.f32 %v3086_v29, %v2790_v12 }
 0xbd5   : > { %v3094_v58 = vsel %vm1579_vm6, %v3089_v54, 0.0 }
 0xbd6   : > { %3095 = vadd.xlane.f32.xlu1 %v3094_v58 }
 0xc40   : > { %v3093_v59 = vpop.xlane.xlu2 %3092 }
 0xc41   : > { %v3097_v62 = vmul.f32 %v3093_v59, %v5067_v56 }
 0xc43   : > { %v3099_v47 = vsub.f32 %v3088_v51, %v3097_v62 }
 0xc45   : > { %v3101_v48 = vmul.f32 %v3099_v47, %v3099_v47 }
 0xc47   : > { %3103 = vadd.xlane.f32.xlu1 %v3101_v48 }
 0xc49   : > { %v3096_v19 = vpop.xlane.xlu1 %3095 }
 0xc4a   : > { %v3098_v63 = vmul.f32 %v3096_v19, %v5067_v56 }
 0xc4c   : > { %v3100_v2 = vsub.f32 %v3089_v54, %v3098_v63 }
 0xc4e   : > { %v3102_v3 = vmul.f32 %v3100_v2, %v3100_v2 }
 0xc50   : > { %v3105_v1 = vsel %vm1579_vm6, %v3102_v3, 0.0 }
 0xc51   : > { %3106 = vadd.xlane.f32.xlu0 %v3105_v1 }
 0xcba   : > { %v3104_v11 = vpop.xlane.xlu1 %3103 }
 0xcbb   : > { %v3108_v8 = vmul.f32 %v3104_v11, %v5067_v56 }
 0xcbd   : > { %v3110_v9 = vadd.f32 1e-05, %v3108_v8 }
 0xcbf   : > { %4090 = vrsqrt.f32 %v3110_v9  ;;  %vm3118_vm6 = vweird.f32 %v3110_v9 }
 0xcc4   : > { %v3107_v10 = vpop.xlane.xlu0 %3106 }
 0xcc5   : > { %v4091_v7 = vpop.eup %4090  ;;  %v3109_v13 = vmul.f32 %v3107_v10, %v5067_v56  ;;  %v4019_v56 = vld [vmem:[%s5139_s24] ss:$0 sm:$0xff] }
 0xcc6   : > { %v3113_v17 = vmul.f32 %v4091_v7, %v3110_v9  ;;  %vm3119_vm7 = vweird.f32 %v4091_v7 }
 0xcc7   : > { %v3111_v18 = vadd.f32 1e-05, %v3109_v13  ;;  %vm3120_vm8 = vmor %vm3118_vm6, %vm3119_vm7 }
 0xcc8   : > { %v3114_v22 = vmul.f32 %v4091_v7, %v3113_v17 }
 0xcc9   : > { %4092 = vrsqrt.f32 %v3111_v18  ;;  %vm3128_vm10 = vweird.f32 %v3111_v18 }
 0xcca   : > { %v3115_v23 = vmul.f32 0.5, %v3114_v22 }
 0xccc   : > { %v3116_v24 = vsub.f32 1.5, %v3115_v23 }
 0xcce   : > { %v3117_v15 = vmul.f32 %v4091_v7, %v3116_v24 }
 0xccf   : > { %v4093_v16 = vpop.eup %4092 }
 0xcd0   : > { %v3121_v12 = vsel %vm3120_vm8, %v4091_v7, %v3117_v15  ;;  %v3123_v28 = vmul.f32 %v4093_v16, %v3111_v18  ;;  %vm3129_vm9 = vweird.f32 %v4093_v16 }
 0xcd1   : > { %v3132_v45 = vmul.f32 %v3121_v12, %v3099_v47  ;;  %vm3130_vm11 = vmor %vm3128_vm10, %vm3129_vm9 }
 0xcd2   : > { %v3124_v60 = vmul.f32 %v4093_v16, %v3123_v28 }
 0xcd3   : > { %v3137_v31 = vmul.f32 %v4018_v26, %v3132_v45 }
 0xcd4   : > { %v3125_v35 = vmul.f32 0.5, %v3124_v60 }
 0xcd5   : > { %v3142_v61 = vadd.f32 %v4019_v56, %v3137_v31 }
 0xcd6   : > { %v3126_v0 = vsub.f32 1.5, %v3125_v35 }
 0xcd7   : > { %3144 = vst [vmem:[%s908_s7] sm:$0xff] %v3142_v61 }
 0xcd8   : > { %v3127_v34 = vmul.f32 %v4093_v16, %v3126_v0 }
 0xcda   : > { %v3131_v36 = vsel %vm3130_vm11, %v4093_v16, %v3127_v34 }
 0xcdb   : > { %v3133_v33 = vmul.f32 %v3131_v36, %v3100_v2 }
 0xcdd   : > { %v3138_v25 = vmul.f32 %v4018_v26, %v3133_v33 }
 0xcdf   : > { %v3143_v6 = vadd.f32 %v4019_v56, %v3138_v25 }
 0xce1   : > { %3145 = vst [vmem:[%s908_s7 + $0x8] sm:$0x1] %v3143_v6 }
 0xce2 PF: > { %s5174_s2 = sld [smem:[#allocation20_spill]] }
 0xce8   : > { %s40_s29 = sadd.s32 1, %s5174_s2  }
 0xce9   : > { %p37_p7 = scmp.ge.s32.totalorder %s40_s29, 4  }
 0xceb   :  { %39 = sbr.rel (!%p37_p7) target bundleno = 20 (0x14), region = 186 }
 0xcf0   :  { %3167 = vsyncpa [#allocation3], 1 }
 0xcf1   :  { %3169 = vsyncpa [#allocation3 + $0x1], 1 }
 0xcf2   :  { %3170 = vsyncpa [#allocation5], 1 }
 0xcf3   :  { %3171 = vsyncpa [#allocation8], 1 }
 0xcf4   :  { %3172 = vsyncpa [#allocation11], 1 }
 0xcf5   :  { %3173 = vsyncpa [#allocation14], 1 }

</bundles_post_ra>
